<compile_context>
chip_gen: v7x
topology: tpu7x:2x2x1
jax: 0.10.0
libtpu: 0.0.40
codegen_flags: <defaults>
</compile_context>

<pallas_src>
import functools

import jax
import jax.numpy as jnp
from jax.experimental import pallas as pl
from jax.experimental.pallas import tpu as pltpu


# --------------------------------------------------------------------------- #
# Pallas kernel: dice / cross-entropy sufficient statistics over spatial tiles #
# --------------------------------------------------------------------------- #
def _ssn_stats_kernel(mean_ref, delta_ref, tgt_ref, inter_ref, sprob_ref, lp_ref):
    k = pl.program_id(1)

    @pl.when(k == 0)
    def _():
        inter_ref[...] = jnp.zeros_like(inter_ref)
        sprob_ref[...] = jnp.zeros_like(sprob_ref)
        lp_ref[...] = jnp.zeros_like(lp_ref)

    mean = mean_ref[...].astype(jnp.float32)        # (B, C, T)
    delta = delta_ref[...].astype(jnp.float32)      # (Sh, B, C, T)
    tgt = tgt_ref[...]                              # (B, T) int32

    B, C, T = mean.shape

    # One-hot target built in-register (no HBM one-hot array).
    klass = jax.lax.broadcasted_iota(jnp.int32, (B, C, T), 1)
    oh = (tgt[:, None, :] == klass).astype(jnp.float32)          # (B, C, T)
    ohb = oh[None]                                               # (1, B, C, T)

    # Antithetic reconstruction: [mean, mean + delta, mean - delta] -> (S1, B, C, T)
    logits = jnp.concatenate(
        [mean[None], mean[None] + delta, mean[None] - delta], axis=0)

    # Numerically stable softmax / log-sum-exp over the class axis (axis=2).
    m = jnp.max(logits, axis=2, keepdims=True)                   # (S1, B, 1, T)
    e = jnp.exp(logits - m)
    denom = jnp.sum(e, axis=2, keepdims=True)                    # (S1, B, 1, T)
    probs = e * pl.reciprocal(denom, approx=True)                # (S1, B, C, T)
    lse = jnp.squeeze(m, axis=2) + jnp.log(jnp.squeeze(denom, axis=2))  # (S1, B, T)

    # SoftDice statistics (per sample, per class; summed over batch & voxels).
    inter_ref[...] += jnp.sum(probs * ohb, axis=(1, 3))[None]    # (1, S1, C)
    sprob_ref[...] += jnp.sum(probs, axis=(1, 3))[None]          # (1, S1, C)

    # Log-likelihood statistics: sum_v [ logit_at_target - logsumexp ].
    tgt_logit = jnp.sum(ohb * logits, axis=2)                    # (S1, B, T)
    lp_ref[...] += jnp.sum(tgt_logit - lse, axis=-1)[None]       # (1, S1, B)


def _pick_tiling(V, S1, B, C, budget_bytes=20 * 1024 * 1024):
    """Largest multiple-of-128 spatial tile per core that fits a VMEM budget."""
    Cp = ((C + 7) // 8) * 8            # f32 sublane padding of the class axis
    Sh = (S1 - 1) // 2

    def vmem_estimate(tile):
        # double-buffered input blocks (mean + delta f32, target int32)
        in_bytes = 4 * tile * (B * Cp * (1 + Sh) + B)
        # in-kernel intermediates (stacked logits / exp / probs / one-hot / lse ...)
        tmp_bytes = 6 * 4 * tile * S1 * B * Cp
        return 2 * in_bytes + tmp_bytes

    # nc=2 feeds both v7x TensorCores; on 1-TC chips it is just a sequential loop.
    for nc in (2, 1):
        if V % (nc * 128) != 0:
            continue
        per_core = V // nc
        tiles = sorted(
            {t for t in range(128, per_core + 1, 128) if per_core % t == 0},
            reverse=True)
        for tile in tiles:
            if vmem_estimate(tile) <= budget_bytes:
                return nc, tile
    raise ValueError(f"flattened spatial size {V} must be a multiple of 128")


def ssn_loss_stats(mean, delta, target):
    """Run the Pallas reduction kernel over spatial tiles.

    mean  : (B, C, V) float
    delta : (S/2, B, C, V) float   (antithetic deltas, rsample - mean)
    target: (B, V) int32
    returns inter (S+1, C), sum_probs (S+1, C), log_prob (S+1, B)
    """
    B, C, V = mean.shape
    Sh = delta.shape[0]
    S1 = 2 * Sh + 1

    nc, tile = _pick_tiling(V, S1, B, C)
    kk = V // (nc * tile)

    inter, sprob, lp = pl.pallas_call(
        _ssn_stats_kernel,
        out_shape=(
            jax.ShapeDtypeStruct((nc, S1, C), jnp.float32),
            jax.ShapeDtypeStruct((nc, S1, C), jnp.float32),
            jax.ShapeDtypeStruct((nc, S1, B), jnp.float32),
        ),
        grid=(nc, kk),
        in_specs=[
            pl.BlockSpec((B, C, tile), lambda p, k: (0, 0, p * kk + k)),
            pl.BlockSpec((Sh, B, C, tile), lambda p, k: (0, 0, 0, p * kk + k)),
            pl.BlockSpec((B, tile), lambda p, k: (0, p * kk + k)),
        ],
        out_specs=(
            pl.BlockSpec((1, S1, C), lambda p, k: (p, 0, 0)),
            pl.BlockSpec((1, S1, C), lambda p, k: (p, 0, 0)),
            pl.BlockSpec((1, S1, B), lambda p, k: (p, 0, 0)),
        ),
        compiler_params=pltpu.CompilerParams(
            dimension_semantics=("parallel", "arbitrary"),
            vmem_limit_bytes=32 * 1024 * 1024,
        ),
    )(mean, delta, target)

    # Sum the per-core partials.
    return inter.sum(axis=0), sprob.sum(axis=0), lp.sum(axis=0)


# --------------------------------------------------------------------------- #
# Full loss (plain-JAX scalar combination of the kernel statistics)            #
# --------------------------------------------------------------------------- #
@functools.partial(jax.jit, static_argnames=("mc_samples",))
def ssn_combined_dice_xent_loss(logit_mean, cov_factor, cov_diag, target, key,
                                mc_samples=10, dice_factor=5.0, xent_factor=0.01,
                                sample_dice_coeff=0.05, dice_eps=1e-7):
    """SSNCombinedDiceXentLoss forward pass.

    logit_mean: (B, C, H, W)  -- distribution.mean
    cov_factor: (B, C*H*W, R) -- low-rank covariance factor of the SSN distribution
    cov_diag  : (B, C*H*W)    -- positive diagonal covariance
    target    : (B, H, W)     -- integer class labels
    """
    assert mc_samples % 2 == 0
    B, C, H, W = logit_mean.shape
    V = H * W
    N = C * V
    half = mc_samples // 2
    R = cov_factor.shape[-1]

    # Antithetic deltas (rsample - mean) of the low-rank MVN, kept un-concatenated.
    k_r, k_d = jax.random.split(key)
    eps_r = jax.random.normal(k_r, (half, B, R), dtype=jnp.float32)
    eps_d = jax.random.normal(k_d, (half, B, N), dtype=jnp.float32)
    delta = (jnp.einsum("bnr,sbr->sbn", cov_factor, eps_r)
             + jnp.sqrt(cov_diag)[None] * eps_d)                 # (half, B, N)

    mean_bcv = logit_mean.reshape(B, C, V)
    delta_bcv = delta.reshape(half, B, C, V)
    tgt = target.reshape(B, V).astype(jnp.int32)

    inter, sprob, lp = ssn_loss_stats(mean_bcv, delta_bcv, tgt)

    # Sample-independent part of the dice cardinality: per-class voxel counts.
    class_count = jnp.sum(
        (tgt[..., None] == jnp.arange(C, dtype=jnp.int32)).astype(jnp.float32),
        axis=(0, 1))                                             # (C,)
    card = sprob + class_count[None, :]                          # (S+1, C)

    # ---- SsnNetworkMuAndSamplesLossWrapper(SoftDiceV2) ----
    dice_losses = 1.0 - jnp.mean(2.0 * inter / (card + dice_eps), axis=1)  # (S+1,)
    dice_part = (dice_losses[0]
                 + sample_dice_coeff * jnp.sum(dice_losses[1:]) / mc_samples
                 ) / (1.0 + sample_dice_coeff)

    # ---- StochasticSegmentationNetworkLossMCIntegral ----
    lp_samples = lp[1:]                                          # (S, B)
    loglikelihood = jnp.mean(
        jax.scipy.special.logsumexp(lp_samples, axis=0) - jnp.log(float(mc_samples)))
    xent_part = -loglikelihood / V                               # n_voxels = H*W

    return dice_part * dice_factor + xent_part * xent_factor


if __name__ == "__main__":
    key = jax.random.PRNGKey(0)
    k_mean, k_cf, k_cd, k_tgt, k_smp = jax.random.split(key, 5)

    B, C, H, W, R, S = 2, 4, 16, 16, 8, 10
    N = C * H * W

    logit_mean = jax.random.normal(k_mean, (B, C, H, W), dtype=jnp.float32)
    cov_factor = 0.1 * jax.random.normal(k_cf, (B, N, R), dtype=jnp.float32)
    cov_diag = jax.nn.softplus(jax.random.normal(k_cd, (B, N), dtype=jnp.float32)) + 1e-3
    target = jax.random.randint(k_tgt, (B, H, W), 0, C)

    loss = ssn_combined_dice_xent_loss(logit_mean, cov_factor, cov_diag, target,
                                       k_smp, mc_samples=S)
    jax.block_until_ready(loss)
    print("KERNEL_OK")
</pallas_src>

<mosaic_0001>
module attributes {stable_mosaic.version = 11 : i64} {
  func.func @_ssn_stats_kernel(%arg0: i32, %arg1: i32, %arg2: memref<2x4x128xf32, #tpu.memory_space<vmem>>, %arg3: memref<5x2x4x128xf32, #tpu.memory_space<vmem>>, %arg4: memref<2x128xi32, #tpu.memory_space<vmem>>, %arg5: memref<1x11x4xf32, #tpu.memory_space<vmem>>, %arg6: memref<1x11x4xf32, #tpu.memory_space<vmem>>, %arg7: memref<1x11x2xf32, #tpu.memory_space<vmem>>) attributes {dimension_semantics = [#tpu.dimension_semantics<parallel>, #tpu.dimension_semantics<arbitrary>], iteration_bounds = array<i64: 2, 1>, scalar_prefetch = 0 : i64, scratch_operands = 0 : i64, tpu.core_type = #tpu.core_type<tc>, window_params = [{transform_indices = @transform_0, window_bounds = array<i64: 2, 4, 128>}, {transform_indices = @transform_1, window_bounds = array<i64: 5, 2, 4, 128>}, {transform_indices = @transform_2, window_bounds = array<i64: 2, 128>}, {transform_indices = @transform_3, window_bounds = array<i64: 1, 11, 4>}, {transform_indices = @transform_4, window_bounds = array<i64: 1, 11, 4>}, {transform_indices = @transform_5, window_bounds = array<i64: 1, 11, 2>}]} {
    %c0_i32 = arith.constant 0 : i32
    %0 = arith.cmpi eq, %arg1, %c0_i32 : i32
    %1 = arith.extui %0 : i1 to i32
    %c0_i32_0 = arith.constant 0 : i32
    %2 = arith.cmpi ne, %1, %c0_i32_0 : i32
    scf.if %2 {
      %cst_32 = arith.constant 0.000000e+00 : f32
      %56 = vector.broadcast %cst_32 : f32 to vector<1x11x4xf32>
      %c0_33 = arith.constant 0 : index
      %c0_34 = arith.constant 0 : index
      %c0_35 = arith.constant 0 : index
      %57 = vector.load %arg5[%c0_33, %c0_34, %c0_35] : memref<1x11x4xf32, #tpu.memory_space<vmem>>, vector<1x11x4xf32>
      tpu.vector_store %arg5[%c0_33, %c0_34, %c0_35], %56 {strides = array<i32>} : memref<1x11x4xf32, #tpu.memory_space<vmem>>, vector<1x11x4xf32>,
      %cst_36 = arith.constant 0.000000e+00 : f32
      %58 = vector.broadcast %cst_36 : f32 to vector<1x11x4xf32>
      %c0_37 = arith.constant 0 : index
      %c0_38 = arith.constant 0 : index
      %c0_39 = arith.constant 0 : index
      %59 = vector.load %arg6[%c0_37, %c0_38, %c0_39] : memref<1x11x4xf32, #tpu.memory_space<vmem>>, vector<1x11x4xf32>
      tpu.vector_store %arg6[%c0_37, %c0_38, %c0_39], %58 {strides = array<i32>} : memref<1x11x4xf32, #tpu.memory_space<vmem>>, vector<1x11x4xf32>,
      %cst_40 = arith.constant 0.000000e+00 : f32
      %60 = vector.broadcast %cst_40 : f32 to vector<1x11x2xf32>
      %c0_41 = arith.constant 0 : index
      %c0_42 = arith.constant 0 : index
      %c0_43 = arith.constant 0 : index
      %61 = vector.load %arg7[%c0_41, %c0_42, %c0_43] : memref<1x11x2xf32, #tpu.memory_space<vmem>>, vector<1x11x2xf32>
      tpu.vector_store %arg7[%c0_41, %c0_42, %c0_43], %60 {strides = array<i32>} : memref<1x11x2xf32, #tpu.memory_space<vmem>>, vector<1x11x2xf32>,
    } else {
    }
    %c0 = arith.constant 0 : index
    %c0_1 = arith.constant 0 : index
    %c0_2 = arith.constant 0 : index
    %3 = vector.load %arg2[%c0, %c0_1, %c0_2] : memref<2x4x128xf32, #tpu.memory_space<vmem>>, vector<2x4x128xf32>
    %c0_3 = arith.constant 0 : index
    %c0_4 = arith.constant 0 : index
    %c0_5 = arith.constant 0 : index
    %c0_6 = arith.constant 0 : index
    %4 = vector.load %arg3[%c0_3, %c0_4, %c0_5, %c0_6] : memref<5x2x4x128xf32, #tpu.memory_space<vmem>>, vector<5x2x4x128xf32>
    %c0_7 = arith.constant 0 : index
    %c0_8 = arith.constant 0 : index
    %5 = vector.load %arg4[%c0_7, %c0_8] : memref<2x128xi32, #tpu.memory_space<vmem>>, vector<2x128xi32>
    %6 = tpu.iota {dimensions = array<i32: 1>} : vector<2x4x128xi32>
    %7 = vector.shape_cast %5 : vector<2x128xi32> to vector<2x1x128xi32>
    %8 = vector.broadcast %7 : vector<2x1x128xi32> to vector<2x4x128xi32>
    %9 = arith.cmpi eq, %8, %6 : vector<2x4x128xi32>
    %10 = arith.extui %9 : vector<2x4x128xi1> to vector<2x4x128xi32>
    %11 = arith.sitofp %10 : vector<2x4x128xi32> to vector<2x4x128xf32>
    %12 = vector.shape_cast %11 : vector<2x4x128xf32> to vector<1x2x4x128xf32>
    %13 = vector.shape_cast %3 : vector<2x4x128xf32> to vector<1x2x4x128xf32>
    %14 = vector.shape_cast %3 : vector<2x4x128xf32> to vector<1x2x4x128xf32>
    %15 = vector.broadcast %14 : vector<1x2x4x128xf32> to vector<5x2x4x128xf32>
    %16 = arith.addf %15, %4 : vector<5x2x4x128xf32>
    %17 = vector.shape_cast %3 : vector<2x4x128xf32> to vector<1x2x4x128xf32>
    %18 = vector.broadcast %17 : vector<1x2x4x128xf32> to vector<5x2x4x128xf32>
    %19 = arith.subf %18, %4 : vector<5x2x4x128xf32>
    %20 = tpu.concatenate %13, %16, %19 in 0 : vector<1x2x4x128xf32>, vector<5x2x4x128xf32>, vector<5x2x4x128xf32> -> vector<11x2x4x128xf32>
    %cst = arith.constant dense<0xFF800000> : vector<11x2x128xf32>
    %21 = vector.multi_reduction <maximumf>, %20, %cst [2] : vector<11x2x4x128xf32> to vector<11x2x128xf32>
    %22 = vector.shape_cast %21 : vector<11x2x128xf32> to vector<11x2x1x128xf32>
    %23 = vector.broadcast %22 : vector<11x2x1x128xf32> to vector<11x2x4x128xf32>
    %24 = arith.subf %20, %23 : vector<11x2x4x128xf32>
    %25 = math.exp %24 : vector<11x2x4x128xf32>
    %cst_9 = arith.constant dense<0.000000e+00> : vector<11x2x128xf32>
    %26 = vector.multi_reduction <add>, %25, %cst_9 [2] : vector<11x2x4x128xf32> to vector<11x2x128xf32>
    %27 = vector.shape_cast %26 : vector<11x2x128xf32> to vector<11x2x1x128xf32>
    %28 = tpu.reciprocal %27 {approx = true} : vector<11x2x1x128xf32> -> vector<11x2x1x128xf32>
    %29 = vector.broadcast %28 : vector<11x2x1x128xf32> to vector<11x2x4x128xf32>
    %30 = arith.mulf %25, %29 : vector<11x2x4x128xf32>
    %31 = vector.shape_cast %22 : vector<11x2x1x128xf32> to vector<11x2x128xf32>
    %32 = vector.shape_cast %27 : vector<11x2x1x128xf32> to vector<11x2x128xf32>
    %33 = math.log %32 : vector<11x2x128xf32>
    %34 = arith.addf %31, %33 : vector<11x2x128xf32>
    %c0_10 = arith.constant 0 : index
    %c0_11 = arith.constant 0 : index
    %c0_12 = arith.constant 0 : index
    %35 = vector.load %arg5[%c0_10, %c0_11, %c0_12] : memref<1x11x4xf32, #tpu.memory_space<vmem>>, vector<1x11x4xf32>
    %36 = vector.broadcast %12 : vector<1x2x4x128xf32> to vector<11x2x4x128xf32>
    %37 = arith.mulf %30, %36 : vector<11x2x4x128xf32>
    %cst_13 = arith.constant dense<0.000000e+00> : vector<11x4xf32>
    %38 = vector.multi_reduction <add>, %37, %cst_13 [1, 3] : vector<11x2x4x128xf32> to vector<11x4xf32>
    %39 = vector.shape_cast %38 : vector<11x4xf32> to vector<1x11x4xf32>
    %40 = arith.addf %35, %39 : vector<1x11x4xf32>
    %c0_14 = arith.constant 0 : index
    %c0_15 = arith.constant 0 : index
    %c0_16 = arith.constant 0 : index
    %41 = vector.load %arg5[%c0_14, %c0_15, %c0_16] : memref<1x11x4xf32, #tpu.memory_space<vmem>>, vector<1x11x4xf32>
    tpu.vector_store %arg5[%c0_14, %c0_15, %c0_16], %40 {strides = array<i32>} : memref<1x11x4xf32, #tpu.memory_space<vmem>>, vector<1x11x4xf32>,
    %c0_17 = arith.constant 0 : index
    %c0_18 = arith.constant 0 : index
    %c0_19 = arith.constant 0 : index
    %42 = vector.load %arg6[%c0_17, %c0_18, %c0_19] : memref<1x11x4xf32, #tpu.memory_space<vmem>>, vector<1x11x4xf32>
    %cst_20 = arith.constant dense<0.000000e+00> : vector<11x4xf32>
    %43 = vector.multi_reduction <add>, %30, %cst_20 [1, 3] : vector<11x2x4x128xf32> to vector<11x4xf32>
    %44 = vector.shape_cast %43 : vector<11x4xf32> to vector<1x11x4xf32>
    %45 = arith.addf %42, %44 : vector<1x11x4xf32>
    %c0_21 = arith.constant 0 : index
    %c0_22 = arith.constant 0 : index
    %c0_23 = arith.constant 0 : index
    %46 = vector.load %arg6[%c0_21, %c0_22, %c0_23] : memref<1x11x4xf32, #tpu.memory_space<vmem>>, vector<1x11x4xf32>
    tpu.vector_store %arg6[%c0_21, %c0_22, %c0_23], %45 {strides = array<i32>} : memref<1x11x4xf32, #tpu.memory_space<vmem>>, vector<1x11x4xf32>,
    %47 = vector.broadcast %12 : vector<1x2x4x128xf32> to vector<11x2x4x128xf32>
    %48 = arith.mulf %47, %20 : vector<11x2x4x128xf32>
    %cst_24 = arith.constant dense<0.000000e+00> : vector<11x2x128xf32>
    %49 = vector.multi_reduction <add>, %48, %cst_24 [2] : vector<11x2x4x128xf32> to vector<11x2x128xf32>
    %c0_25 = arith.constant 0 : index
    %c0_26 = arith.constant 0 : index
    %c0_27 = arith.constant 0 : index
    %50 = vector.load %arg7[%c0_25, %c0_26, %c0_27] : memref<1x11x2xf32, #tpu.memory_space<vmem>>, vector<1x11x2xf32>
    %51 = arith.subf %49, %34 : vector<11x2x128xf32>
    %cst_28 = arith.constant dense<0.000000e+00> : vector<11x2xf32>
    %52 = vector.multi_reduction <add>, %51, %cst_28 [2] : vector<11x2x128xf32> to vector<11x2xf32>
    %53 = vector.shape_cast %52 : vector<11x2xf32> to vector<1x11x2xf32>
    %54 = arith.addf %50, %53 : vector<1x11x2xf32>
    %c0_29 = arith.constant 0 : index
    %c0_30 = arith.constant 0 : index
    %c0_31 = arith.constant 0 : index
    %55 = vector.load %arg7[%c0_29, %c0_30, %c0_31] : memref<1x11x2xf32, #tpu.memory_space<vmem>>, vector<1x11x2xf32>
    tpu.vector_store %arg7[%c0_29, %c0_30, %c0_31], %54 {strides = array<i32>} : memref<1x11x2xf32, #tpu.memory_space<vmem>>, vector<1x11x2xf32>,
    return
  }
  func.func @transform_0(%arg0: i32, %arg1: i32) -> (i32, i32, i32) {
    %c1_i32 = arith.constant 1 : i32
    %0 = arith.muli %arg0, %c1_i32 : i32
    %1 = arith.addi %0, %arg1 : i32
    %c0_i32 = arith.constant 0 : i32
    %c0_i32_0 = arith.constant 0 : i32
    %c0_i32_1 = arith.constant 0 : i32
    return %c0_i32, %c0_i32_0, %1 : i32, i32, i32
  }
  func.func @transform_1(%arg0: i32, %arg1: i32) -> (i32, i32, i32, i32) {
    %c1_i32 = arith.constant 1 : i32
    %0 = arith.muli %arg0, %c1_i32 : i32
    %1 = arith.addi %0, %arg1 : i32
    %c0_i32 = arith.constant 0 : i32
    %c0_i32_0 = arith.constant 0 : i32
    %c0_i32_1 = arith.constant 0 : i32
    %c0_i32_2 = arith.constant 0 : i32
    return %c0_i32, %c0_i32_0, %c0_i32_1, %1 : i32, i32, i32, i32
  }
  func.func @transform_2(%arg0: i32, %arg1: i32) -> (i32, i32) {
    %c1_i32 = arith.constant 1 : i32
    %0 = arith.muli %arg0, %c1_i32 : i32
    %1 = arith.addi %0, %arg1 : i32
    %c0_i32 = arith.constant 0 : i32
    %c0_i32_0 = arith.constant 0 : i32
    return %c0_i32, %1 : i32, i32
  }
  func.func @transform_3(%arg0: i32, %arg1: i32) -> (i32, i32, i32) {
    %c0_i32 = arith.constant 0 : i32
    %c0_i32_0 = arith.constant 0 : i32
    %c0_i32_1 = arith.constant 0 : i32
    return %arg0, %c0_i32, %c0_i32_0 : i32, i32, i32
  }
  func.func @transform_4(%arg0: i32, %arg1: i32) -> (i32, i32, i32) {
    %c0_i32 = arith.constant 0 : i32
    %c0_i32_0 = arith.constant 0 : i32
    %c0_i32_1 = arith.constant 0 : i32
    return %arg0, %c0_i32, %c0_i32_0 : i32, i32, i32
  }
  func.func @transform_5(%arg0: i32, %arg1: i32) -> (i32, i32, i32) {
    %c0_i32 = arith.constant 0 : i32
    %c0_i32_0 = arith.constant 0 : i32
    %c0_i32_1 = arith.constant 0 : i32
    return %arg0, %c0_i32, %c0_i32_0 : i32, i32, i32
  }
}

</mosaic_0001>

<bundles_post_ra>
// kernel: ssn_combined_dice_xent_loss.1
= control target key start
LH: loop header
LB: loop body
LE: loop exit
PB: predicated region body
PF: predicated region fallthrough
CT: control target
= control target key end

     0   :  { %s2082_s18 = smov 0   ;;  %s2084_s19 = smov 0   ;;  %s3007_s0 = inlined_call_operand.vmem [shape: f32[2,4,256], index: 0, kind: input, shape index: {}]   ;;  %s3008_s1 = inlined_call_operand.vmem [shape: f32[5,2,4,256], index: 1, kind: input, shape index: {}]   ;;  %s3009_s2 = inlined_call_operand.vmem [shape: s32[2,256], index: 2, kind: input, shape index: {}]   ;;  %s3010_s3 = inlined_call_operand.vmem [shape: f32[2,11,4], index: 3, kind: output, shape index: {0}]   ;;  %s3011_s4 = inlined_call_operand.vmem [shape: f32[2,11,4], index: 4, kind: output, shape index: {1}]   ;;  %s3012_s5 = inlined_call_operand.vmem [shape: f32[2,11,2], index: 5, kind: output, shape index: {2}]  }
   0x1   :  { %s2086_s20 = smov 0   ;;  %s2088_s21 = smov 0  }
   0x2   :  { %s2090_s22 = smov 0  }
   0x3 LB: > { %s28_s23 = sadd.s32 1, %s2044_s21  ;;  %p44_p1 = scmp.ne.s32.totalorder %s2036_s19, %s2032_s18  ;;  %s2048_s22 = sphi %s2090_s22, %s16_s22   ;;  %s2044_s21 = sphi %s2088_s21, %s3104_s21   ;;  %s2040_s20 = sphi %s2086_s20, %s3103_s20   ;;  %s2036_s19 = sphi %s2084_s19, %s3102_s19   ;;  %s2032_s18 = sphi %s2082_s18, %s3101_s18  }
   0x4   : > { %p30_p0 = scmp.ge.s32.totalorder %s28_s23, 2  ;;  %p45_p2 = scmp.eq.s32.totalorder %s2048_s22, 0 }
   0x5   : > { %s37_s26 = sadd.s32 1, %s2036_s19  ;;  %p1813_p5 = scmp.ge.s32.totalorder %s2048_s22, 2 }
   0x6   : > { %s3106_s23 = smov (%p30_p0, %s28_s23), 0  ;;  %p2113_p3 = por %p45_p2, %p44_p1 }
   0x7   : > { %s34_s25 = ssub.s32 %s2044_s21, %s3106_s23  ;;  %204 = sbr.rel (%p1813_p5) target bundleno = 32 (0x20), region = 16 }
   0x8   : > { %p35_p4 = scmp.eq.s32.totalorder %s34_s25, 0 }
   0xa   : > { %s2121_s27 = scalar_select %p35_p4, %s2036_s19, %s37_s26  }
   0xe   : > { %207 = sbr.rel (!%p2113_p3) target bundleno = 21 (0x15), region = 20  ;;  %s209_s28 = sand.u32 (%p2113_p3), 1, %s2036_s19  }
   0xf   : > { %s1815_s29 = sshll.u32 (%p2113_p3), %s2044_s21, 2  ;;  %s1814_s30 = sshll.u32 (%p2113_p3), %s209_s28, 3 }
  0x10   : > { %s214_s8 = scalar_lea.vmem (%p2113_p3), %s3007_s0, %s1815_s29  ;;  %s211_s9 = scalar_lea.vmem (%p2113_p3), [#allocation2], %s1814_s30 }
  0x11   : > { %v230_v0 = vld [vmem:[%s214_s8] sm:$0xf] (%p2113_p3)  ;;  %v232_v1 = vld [vmem:[%s214_s8 + $0x8] sm:$0xf] (%p2113_p3) }
  0x12   : > { %231 = vst [vmem:[%s211_s9] sm:$0xf] (%p2113_p3), %v230_v0  ;;  %233 = vst [vmem:[%s211_s9 + $0x4] sm:$0xf] (%p2113_p3), %v232_v1 }
  0x15 PF: > { %260 = sbr.rel (!%p2113_p3) target bundleno = 32 (0x20), region = 61  ;;  %s262_s10 = sand.u32 (%p2113_p3), 1, %s2036_s19  }
  0x16   : > { %s1816_s11 = sshll.u32 (%p2113_p3), %s2044_s21, 2  ;;  %s1834_s12 = smul.u32 (%p2113_p3), 40, %s262_s10 }
  0x17   : > { %s267_s15 = scalar_lea.vmem (%p2113_p3), %s3008_s1, %s1816_s11 }
  0x18   : > { %v283_v2 = vld [vmem:[%s267_s15] sm:$0xf] (%p2113_p3)  ;;  %v285_v3 = vld [vmem:[%s267_s15 + $0x8] sm:$0xf] (%p2113_p3)  ;;  %v287_v4 = vld [vmem:[%s267_s15 + $0x10] sm:$0xf] (%p2113_p3) }
  0x19   : > { %v289_v5 = vld [vmem:[%s267_s15 + $0x18] sm:$0xf] (%p2113_p3)  ;;  %v291_v6 = vld [vmem:[%s267_s15 + $0x20] sm:$0xf] (%p2113_p3)  ;;  %s264_s16 = scalar_lea.vmem (%p2113_p3), [#allocation3], %s1834_s12 }
  0x1a   : > { %284 = vst [vmem:[%s264_s16] sm:$0xf] (%p2113_p3), %v283_v2  ;;  %286 = vst [vmem:[%s264_s16 + $0x4] sm:$0xf] (%p2113_p3), %v285_v3  ;;  %v293_v7 = vld [vmem:[%s267_s15 + $0x28] sm:$0xf] (%p2113_p3) }
  0x1b   : > { %288 = vst [vmem:[%s264_s16 + $0x8] sm:$0xf] (%p2113_p3), %v287_v4  ;;  %290 = vst [vmem:[%s264_s16 + $0xc] sm:$0xf] (%p2113_p3), %v289_v5  ;;  %v295_v8 = vld [vmem:[%s267_s15 + $0x30] sm:$0xf] (%p2113_p3) }
  0x1c   : > { %292 = vst [vmem:[%s264_s16 + $0x10] sm:$0xf] %v291_v6  ;;  %v297_v9 = vld [vmem:[%s267_s15 + $0x38] sm:$0xf]  ;;  %294 = vst [vmem:[%s264_s16 + $0x14] sm:$0xf] %v293_v7 }
  0x1d   : > { %296 = vst [vmem:[%s264_s16 + $0x18] sm:$0xf] %v295_v8  ;;  %298 = vst [vmem:[%s264_s16 + $0x1c] sm:$0xf] %v297_v9  ;;  %v299_v10 = vld [vmem:[%s267_s15 + $0x40] sm:$0xf] }
  0x1e   : > { %v301_v11 = vld [vmem:[%s267_s15 + $0x48] sm:$0xf]  ;;  %300 = vst [vmem:[%s264_s16 + $0x20] sm:$0xf] %v299_v10 }
  0x1f   : > { %302 = vst [vmem:[%s264_s16 + $0x24] sm:$0xf] %v301_v11 }
  0x20 PF: > { %p1817_p6 = scmp.ge.s32.totalorder %s2048_s22, 1  ;;  %p353_p7 = scmp.lt.s32.totalorder %s2048_s22, 3 }
  0x22   : > { %p354_p8 = pnand %p1817_p6, %p353_p7 }
  0x24   : > { %357 = sbr.rel (%p354_p8) target bundleno = 410 (0x19a), region = 106 }
  0x2b   : > { %s360_s17 = sand.u32 1, %s2032_s18   ;;  %p416_p9 = scmp.lt.s32.totalorder %s2040_s20, 1  ;;  %v463_v12 = vlaneseq  ;;  %vm521_vm0 = vcmask 1043456   ;;  %v2050_v13 = vmov 1966171168   ;;  %v3013_v59 = vmov 0.0  }
  0x2c   : > { %s1818_s24 = sshll.u32 %s360_s17, 3  ;;  %v474_v14 = vunpack.c.l.s4 %v2050_v13  ;;  %s1835_s25 = smul.u32 40, %s360_s17  ;;  %vm1142_vm3 = vcmask 1041409   ;;  %vm1537_vm4 = vcmask 1041408   ;;  %vm442_vm5 = vcmask 26624  }
  0x2d   : > { %v464_v15 = vshrl.u32 %v463_v12, 7  ;;  %v1097_v16 = vand.u32 127, %v463_v12  ;;  %s362_s26 = scalar_lea.vmem [#allocation2], %s1818_s24  ;;  %s3108_s20 = smov (!%p416_p9, %s2040_s20), 1  ;;  %vm440_vm6 = vcmask 31744   ;;  %vm446_vm7 = vcmask 15360  }
  0x2e   : > { %v2142_v17 = vld [vmem:[%s362_s26] sm:$0xf]  ;;  %v2144_v18 = vld [vmem:[%s362_s26 + $0x4] sm:$0xf]  ;;  %v475_v19 = vunpack.c.0.s8 %v474_v14  ;;  %s1819_s18 = sshll.u32 %s3108_s20, 1  ;;  %s2156_s28 = scalar_lea.vmem [#allocation3], %s1835_s25 }
  0x2f   : > { %v522_v20 = vsel %vm521_vm0, %v2142_v17, -inf  ;;  %v529_v21 = vsel %vm521_vm0, %v2144_v18, -inf  ;;  %v2153_v22 = vsub.s32 %v1097_v16, %v464_v15  ;;  %v489_v26 = vsub.s32 0, %v464_v15  ;;  %v452_v27 = vld [vmem:[%s2156_s28] sm:$0xf]  ;;  %s419_s6 = scalar_lea.vmem %s3009_s2, %s1819_s18  ;;  %s2866_s7 = sshll.u32 %s3108_s20, 4 }
  0x30   : > { %v523_v23 = vrot.slane %v522_v20, 4  ;;  %v530_v24 = vrot.slane %v529_v21, 4  ;;  %v478_v25 = vsub.s32 %v475_v19, %v464_v15  ;;  %v2163_v28 = vld [vmem:[%s2156_s28 + $0x4] sm:$0xf]  ;;  %v2166_v29 = vadd.f32 %v452_v27, %v2142_v17  ;;  %v2169_v30 = vld [vmem:[%s2156_s28 + $0x8] sm:$0xf]  ;;  %s2873_s10 = scalar_lea.vmem %s3011_s4, %s2866_s7  ;;  %s2879_s12 = scalar_lea.vmem %s3010_s3, %s2866_s7 }
  0x31   : > { %3044 = vst [vmem:[#allocation4_spill] sm:$0xff] %v2153_v22  ;;  %v2172_v31 = vld [vmem:[%s2156_s28 + $0xc] sm:$0xf]  ;;  %v2175_v32 = vsub.f32 %v2142_v17, %v452_v27  ;;  %v2179_v36 = vadd.f32 %v2163_v28, %v2144_v18  ;;  %v2183_v37 = vadd.f32 %v2169_v30, %v2142_v17  ;;  %v2218_v19 = vld [vmem:[%s2156_s28 + $0x10] sm:$0xf]  ;;  %s2902_s15 = scalar_lea.vmem %s3012_s5, %s2866_s7  ;;  %vm448_vm8 = vcmask 10240  }
  0x32   : > { %v524_v33 = vmax.f32 %v522_v20, %v523_v23  ;;  %v531_v34 = vmax.f32 %v529_v21, %v530_v24  ;;  %v1826_v35 = vld.sshfl [vmem:[%s419_s6] sm:$0x11 pattern:$0x75316420]  ;;  %v536_v40 = vsel %vm521_vm0, %v2166_v29, -inf  ;;  %v2189_v41 = vadd.f32 %v2172_v31, %v2144_v18 }
  0x33   : > { %3045 = vst [vmem:[#allocation5_spill] sm:$0xff] %v2175_v32  ;;  %3046 = vst [vmem:[#allocation6_spill] sm:$0xff] %v2183_v37  ;;  %v472_v38 = vcombine.high %v1826_v35, %v1826_v35  ;;  %v479_v39 = vrot.slane %v1826_v35, %v478_v25  ;;  %v537_v44 = vrot.slane %v536_v40, 4  ;;  %v543_v45 = vsel %vm521_vm0, %v2179_v36, -inf }
  0x34   : > { %3047 = vst [vmem:[#allocation7_spill] sm:$0xff] %v2189_v41  ;;  %v525_v42 = vrot.slane %v524_v33, 2  ;;  %v532_v43 = vrot.slane %v531_v34, 2  ;;  %v544_v48 = vrot.slane %v543_v45, 4  ;;  %v550_v49 = vsel %vm521_vm0, %v2183_v37, -inf }
  0x35   : > { %v486_v46 = vrot.slane %v472_v38, %v478_v25  ;;  %v490_v47 = vrot.slane %v479_v39, %v489_v26  ;;  %v538_v52 = vmax.f32 %v536_v40, %v537_v44  ;;  %v551_v53 = vrot.slane %v550_v49, 4 }
  0x36   : > { %v526_v50 = vmax.f32 %v524_v33, %v525_v42  ;;  %v533_v51 = vmax.f32 %v531_v34, %v532_v43  ;;  %v545_v55 = vmax.f32 %v543_v45, %v544_v48  ;;  %v557_v56 = vsel %vm521_vm0, %v2189_v41, -inf  ;;  %v2225_v34 = vld [vmem:[%s2156_s28 + $0x14] sm:$0xf] }
  0x37   : > { %v494_v54 = vrot.slane %v486_v46, %v489_v26  ;;  %vm495_vm1 = vcmp.eq.s32.totalorder %v490_v47, %v464_v15  ;;  %v539_v61 = vrot.slane %v538_v52, 2  ;;  %v552_v0 = vmax.f32 %v550_v49, %v551_v53 }
  0x38   : > { %v527_v57 = vrot.slane %v526_v50, 1  ;;  %v534_v58 = vrot.slane %v533_v51, 1  ;;  %v2198_v60 = vsel %vm495_vm1, 1.0, %v3013_v59  ;;  %v546_v62 = vrot.slane %v545_v55, 2 }
  0x39   : > { %vm496_vm2 = vcmp.eq.s32.totalorder %v494_v54, %v464_v15  ;;  %v1293_v63 = vmul.f32 %v2198_v60, %v2142_v17  ;;  %v540_v4 = vmax.f32 %v538_v52, %v539_v61  ;;  %v553_v8 = vrot.slane %v552_v0, 2 }
  0x3a   : > { %v2202_v1 = vmax.f32 %v526_v50, %v527_v57  ;;  %v2204_v2 = vmax.f32 %v533_v51, %v534_v58  ;;  %v2207_v3 = vsel %vm496_vm2, 1.0, %v3013_v59  ;;  %v547_v5 = vmax.f32 %v545_v55, %v546_v62  ;;  %v2246_v55 = vld [vmem:[%s2156_s28 + $0x18] sm:$0xf]  ;;  %v2254_v62 = vld [vmem:[%s2156_s28 + $0x20] sm:$0xf] }
  0x3b   : > { %v1294_v6 = vmul.f32 %v2207_v3, %v2144_v18  ;;  %v1315_v7 = vsel %vm521_vm0, %v1293_v63, 0.0  ;;  %v541_v11 = vrot.slane %v540_v4, 1  ;;  %v554_v15 = vmax.f32 %v552_v0, %v553_v8 }
  0x3c   : > { %v676_v9 = vsub.f32 %v2142_v17, %v2202_v1  ;;  %v677_v10 = vsub.f32 %v2144_v18, %v2204_v2  ;;  %v1316_v12 = vrot.slane %v1315_v7, 4  ;;  %v548_v13 = vrot.slane %v547_v5, 1 }
  0x3d   : > { %v1322_v14 = vsel %vm521_vm0, %v1294_v6, 0.0  ;;  %v558_v16 = vrot.slane %v557_v56, 4  ;;  %v2220_v23 = vmax.f32 %v540_v4, %v541_v11  ;;  %v555_v27 = vrot.slane %v554_v15, 1  ;;  %v2259_v6 = vld [vmem:[%s2156_s28 + $0x24] sm:$0xf] }
  0x3e   : > { %v698_v20 = vmul.f32 1.442695, %v676_v9  ;;  %v700_v21 = vmul.f32 1.442695, %v677_v10  ;;  %v1317_v24 = vadd.f32 %v1316_v12, %v1315_v7  ;;  %v2222_v25 = vmax.f32 %v547_v5, %v548_v13 }
  0x3f   : > { %v1323_v26 = vrot.slane %v1322_v14, 4  ;;  %v559_v33 = vmax.f32 %v557_v56, %v558_v16  ;;  %v678_v35 = vsub.f32 %v2166_v29, %v2220_v23  ;;  %v2231_v39 = vadd.f32 %v2218_v19, %v2142_v17  ;;  %v2249_v56 = vld [vmem:[%s2156_s28 + $0x1c] sm:$0xf] }
  0x40   : > { %1878 = vpow2.f32 %v698_v20  ;;  %v1318_v38 = vrot.slane %v1317_v24, 2  ;;  %v679_v40 = vsub.f32 %v2179_v36, %v2222_v25  ;;  %v2235_v43 = vmax.f32 %v554_v15, %v555_v27 }
  0x41   : > { %1880 = vpow2.f32 %v700_v21  ;;  %v1324_v42 = vadd.f32 %v1323_v26, %v1322_v14  ;;  %v702_v44 = vmul.f32 1.442695, %v678_v35  ;;  %v560_v46 = vrot.slane %v559_v33, 2 }
  0x42   : > { %3048 = vst [vmem:[#allocation8_spill] sm:$0xff] %v2235_v43  ;;  %v1319_v45 = vadd.f32 %v1318_v38, %v1317_v24  ;;  %v2239_v47 = vadd.f32 %v2225_v34, %v2144_v18  ;;  %v704_v48 = vmul.f32 1.442695, %v679_v40  ;;  %v680_v50 = vsub.f32 %v2183_v37, %v2235_v43 }
  0x43   : > { %v1325_v49 = vrot.slane %v1324_v42, 2  ;;  %v564_v51 = vsel %vm521_vm0, %v2231_v39, -inf  ;;  %1882 = vpow2.f32 %v702_v44  ;;  %v561_v53 = vmax.f32 %v559_v33, %v560_v46 }
  0x44   : > { %v1320_v52 = vrot.slane %v1319_v45, 1  ;;  %v565_v54 = vrot.slane %v564_v51, 4  ;;  %1884 = vpow2.f32 %v704_v48  ;;  %v706_v58 = vmul.f32 1.442695, %v680_v50 }
  0x45   : > { %v1326_v57 = vadd.f32 %v1325_v49, %v1324_v42  ;;  %v571_v61 = vsel %vm521_vm0, %v2239_v47, -inf  ;;  %v562_v0 = vrot.slane %v561_v53, 1  ;;  %v2263_v8 = vadd.f32 %v2246_v55, %v2142_v17 }
  0x46   : > { %v2256_v63 = vadd.f32 %v1320_v52, %v1319_v45  ;;  %v566_v4 = vmax.f32 %v564_v51, %v565_v54  ;;  %v572_v5 = vrot.slane %v571_v61, 4  ;;  %1886 = vpow2.f32 %v706_v58 }
  0x47   : > { %v1327_v7 = vrot.slane %v1326_v57, 1  ;;  %3049 = vst [vmem:[#allocation9_spill] sm:$0xff] %v2263_v8  ;;  %v2267_v9 = vadd.f32 %v2249_v56, %v2144_v18  ;;  %v2269_v10 = vmax.f32 %v561_v53, %v562_v0  ;;  %v2273_v13 = vadd.f32 %v2254_v62, %v2142_v17 }
  0x48   : > { %v567_v11 = vrot.slane %v566_v4, 2  ;;  %v573_v12 = vmax.f32 %v571_v61, %v572_v5  ;;  %v578_v15 = vsel %vm521_vm0, %v2263_v8, -inf  ;;  %v2283_v20 = vadd.f32 %v2259_v6, %v2144_v18 }
  0x49   : > { %3050 = vst [vmem:[#allocation10_spill] sm:$0xff] %v2267_v9  ;;  %3051 = vst [vmem:[#allocation11_spill] sm:$0xff] %v2269_v10  ;;  %v2275_v14 = vadd.f32 %v1327_v7, %v1326_v57  ;;  %v585_v16 = vsel %vm521_vm0, %v2267_v9, -inf  ;;  %v681_v24 = vsub.f32 %v2189_v41, %v2269_v10  ;;  %v579_v33 = vrot.slane %v578_v15, 4 }
  0x4a   : > { %v2285_v21 = vpop.eup %1878  ;;  %v568_v26 = vmax.f32 %v566_v4, %v567_v11  ;;  %v574_v27 = vrot.slane %v573_v12, 2  ;;  %v586_v40 = vrot.slane %v585_v16, 4  ;;  %v2295_v42 = vsel %vm521_vm0, %v2273_v13, -inf }
  0x4b   : > { %v2289_v35 = vpop.eup %1880  ;;  %v742_v38 = vsel %vm521_vm0, %v2285_v21, 0.0  ;;  %v2299_v44 = vsel %vm521_vm0, %v2283_v20, -inf  ;;  %v708_v48 = vmul.f32 1.442695, %v681_v24  ;;  %v580_v52 = vmax.f32 %v578_v15, %v579_v33 }
  0x4c   : > { %v743_v45 = vrot.slane %v742_v38, 4  ;;  %v749_v46 = vsel %vm521_vm0, %v2289_v35, 0.0  ;;  %v569_v49 = vrot.slane %v568_v26, 1  ;;  %v575_v51 = vmax.f32 %v573_v12, %v574_v27 }
  0x4d   : > { %v750_v50 = vrot.slane %v749_v46, 4  ;;  %v587_v53 = vmax.f32 %v585_v16, %v586_v40  ;;  %v2303_v54 = vpop.eup %1882  ;;  %1888 = vpow2.f32 %v708_v48  ;;  %v593_v61 = vrot.slane %v2295_v42, 4 }
  0x4e   : > { %v744_v57 = vadd.f32 %v743_v45, %v742_v38  ;;  %v2305_v58 = vmax.f32 %v568_v26, %v569_v49  ;;  %v2308_v0 = vpop.eup %1884  ;;  %v756_v5 = vsel %vm521_vm0, %v2303_v54, 0.0  ;;  %v576_v7 = vrot.slane %v575_v51, 1 }
  0x4f   : > { %v751_v4 = vadd.f32 %v750_v50, %v749_v46  ;;  %v581_v11 = vrot.slane %v580_v52, 2  ;;  %v757_v12 = vrot.slane %v756_v5, 4  ;;  %v763_v15 = vsel %vm521_vm0, %v2308_v0, 0.0 }
  0x50   : > { %3052 = vst [vmem:[#allocation12_spill] sm:$0xff] %v2305_v58  ;;  %v745_v24 = vrot.slane %v744_v57, 2  ;;  %v682_v16 = vsub.f32 %v2231_v39, %v2305_v58  ;;  %v2316_v26 = vpop.eup %1886  ;;  %v764_v33 = vrot.slane %v763_v15, 4  ;;  %v2318_v38 = vmax.f32 %v575_v51, %v576_v7 }
  0x51   : > { %v752_v27 = vrot.slane %v751_v4, 2  ;;  %v582_v40 = vmax.f32 %v580_v52, %v581_v11  ;;  %v758_v46 = vadd.f32 %v757_v12, %v756_v5  ;;  %v770_v48 = vsel %vm521_vm0, %v2316_v26, 0.0 }
  0x52   : > { %3053 = vst [vmem:[#allocation13_spill] sm:$0xff] %v2318_v38  ;;  %v746_v45 = vadd.f32 %v745_v24, %v744_v57  ;;  %v710_v49 = vmul.f32 1.442695, %v682_v16  ;;  %v765_v59 = vadd.f32 %v764_v33, %v763_v15  ;;  %v771_v22 = vrot.slane %v770_v48, 4 }
  0x53   : > { %v753_v50 = vadd.f32 %v752_v27, %v751_v4  ;;  %v683_v10 = vsub.f32 %v2239_v47, %v2318_v38  ;;  %v759_v41 = vrot.slane %v758_v46, 2  ;;  %v583_v37 = vrot.slane %v582_v40, 1 }
  0x54   : > { %v747_v43 = vrot.slane %v746_v45, 1  ;;  %1890 = vpow2.f32 %v710_v49  ;;  %v766_v51 = vrot.slane %v765_v59, 2  ;;  %v772_v7 = vadd.f32 %v771_v22, %v770_v48 }
  0x55   : > { %v754_v58 = vrot.slane %v753_v50, 1  ;;  %v712_v52 = vmul.f32 1.442695, %v683_v10  ;;  %v760_v5 = vadd.f32 %v759_v41, %v758_v46  ;;  %v2324_v11 = vmax.f32 %v582_v40, %v583_v37 }
  0x56   : > { %v748_v57 = vadd.f32 %v747_v43, %v746_v45  ;;  %v588_v24 = vrot.slane %v587_v53, 2  ;;  %v767_v4 = vadd.f32 %v766_v51, %v765_v59  ;;  %v773_v15 = vrot.slane %v772_v7, 2 }
  0x57   : > { %3054 = vst [vmem:[#allocation14_spill] sm:$0xff] %v2324_v11  ;;  %v755_v12 = vadd.f32 %v754_v58, %v753_v50  ;;  %1892 = vpow2.f32 %v712_v52  ;;  %v2326_v16 = vpop.eup %1888  ;;  %v761_v27 = vrot.slane %v760_v5, 1  ;;  %v684_v49 = vsub.f32 %v2263_v8, %v2324_v11 }
  0x58   : > { %1894 = vrcp.f32 %v748_v57  ;;  %v589_v33 = vmax.f32 %v587_v53, %v588_v24  ;;  %v768_v22 = vrot.slane %v767_v4, 1  ;;  %v774_v10 = vadd.f32 %v773_v15, %v772_v7 }
  0x59   : > { %1896 = vrcp.f32 %v755_v12  ;;  %v777_v37 = vsel %vm521_vm0, %v2326_v16, 0.0  ;;  %v2332_v41 = vadd.f32 %v761_v27, %v760_v5  ;;  %v714_v45 = vmul.f32 1.442695, %v684_v49 }
  0x5a   : > { %1898 = vlog2.f32 %v748_v57  ;;  %v778_v59 = vrot.slane %v777_v37, 4  ;;  %v590_v43 = vrot.slane %v589_v33, 1  ;;  %v2334_v58 = vadd.f32 %v768_v22, %v767_v4 }
  0x5b   : > { %1900 = vlog2.f32 %v755_v12  ;;  %v775_v40 = vrot.slane %v774_v10, 1  ;;  %v594_v48 = vmax.f32 %v2295_v42, %v593_v61  ;;  %v600_v51 = vrot.slane %v2299_v44, 4 }
  0x5c   : > { %1902 = vrcp.f32 %v2332_v41  ;;  %v779_v53 = vadd.f32 %v778_v59, %v777_v37  ;;  %v2337_v46 = vmax.f32 %v589_v33, %v590_v43  ;;  %v2346_v7 = vsub.f32 %v2144_v18, %v2163_v28 }
  0x5d   : > { %1904 = vrcp.f32 %v2334_v58  ;;  %v2341_v50 = vadd.f32 %v775_v40, %v774_v10  ;;  %v595_v24 = vrot.slane %v594_v48, 2  ;;  %v601_v61 = vmax.f32 %v2299_v44, %v600_v51 }
  0x5e   : > { %3055 = vst [vmem:[#allocation15_spill] sm:$0xff] %v2337_v46  ;;  %3056 = vst [vmem:[#allocation16_spill] sm:$0xff] %v2346_v7  ;;  %v2348_v52 = vpop.eup %1890  ;;  %v780_v57 = vrot.slane %v779_v53, 2  ;;  %v685_v5 = vsub.f32 %v2267_v9, %v2337_v46  ;;  %1906 = vpow2.f32 %v714_v45  ;;  %v606_v12 = vsel %vm521_vm0, %v2175_v32, -inf }
  0x5f   : > { %1908 = vrcp.f32 %v2341_v50  ;;  %v784_v42 = vsel %vm521_vm0, %v2348_v52, 0.0  ;;  %v596_v27 = vmax.f32 %v594_v48, %v595_v24  ;;  %v602_v49 = vrot.slane %v601_v61, 2 }
  0x60   : > { %v781_v28 = vadd.f32 %v780_v57, %v779_v53  ;;  %v785_v4 = vrot.slane %v784_v42, 4  ;;  %v716_v15 = vmul.f32 1.442695, %v685_v5  ;;  %v607_v22 = vrot.slane %v606_v12, 4 }
  0x61   : > { %v2358_v33 = vpop.eup %1892  ;;  %v2362_v10 = vsel %vm521_vm0, %v2346_v7, -inf  ;;  %v2366_v37 = vsub.f32 %v2142_v17, %v2218_v19  ;;  %v597_v51 = vrot.slane %v596_v27, 1  ;;  %v603_v57 = vmax.f32 %v601_v61, %v602_v49 }
  0x62   : > { %v1895_v44 = vpop.eup %1894  ;;  %v782_v59 = vrot.slane %v781_v28, 1  ;;  %v786_v43 = vadd.f32 %v785_v4, %v784_v42  ;;  %v791_v40 = vsel %vm521_vm0, %v2358_v33, 0.0  ;;  %1910 = vpow2.f32 %v716_v15 }
  0x63   : > { %3057 = vst [vmem:[#allocation17_spill] sm:$0xff] %v2366_v37  ;;  %v1897_v45 = vpop.eup %1896  ;;  %v918_v53 = vmul.f32 %v1895_v44, %v2285_v21  ;;  %v792_v48 = vrot.slane %v791_v40, 4  ;;  %v2374_v11 = vmax.f32 %v606_v12, %v607_v22  ;;  %vm1144_vm9 = vcmask 1042434  }
  0x64   : > { %v1899_v5 = vpop.eup %1898  ;;  %v919_v24 = vmul.f32 %v1897_v45, %v2289_v35  ;;  %v2372_v46 = vadd.f32 %v782_v59, %v781_v28  ;;  %v787_v19 = vrot.slane %v786_v43, 2  ;;  %vm1146_vm10 = vcmask 1043459  }
  0x65   : > { %v1901_v9 = vpop.eup %1900  ;;  %v1168_v42 = vsel %vm521_vm0, %v918_v53, 0.0  ;;  %v1008_v4 = vmul.f32 %v2198_v60, %v918_v53  ;;  %v941_v15 = vmul.f32 0.6931472, %v1899_v5  ;;  %v793_v8 = vadd.f32 %v792_v48, %v791_v40 }
  0x66   : > { %v1903_v38 = vpop.eup %1902  ;;  %v1169_v21 = vsel %vm521_vm0, %v919_v24, 0.0  ;;  %v1009_v61 = vmul.f32 %v2207_v3, %v919_v24  ;;  %v943_v49 = vmul.f32 0.6931472, %v1901_v9  ;;  %1912 = vrcp.f32 %v2372_v46 }
  0x67   : > { %v1905_v35 = vpop.eup %1904  ;;  %v1170_v28 = vadd.f32 %v1169_v21, %v1168_v42  ;;  %v1030_v12 = vsel %vm521_vm0, %v1008_v4, 0.0  ;;  %v2383_v22 = vmul.f32 %v1903_v38, %v2303_v54  ;;  %v984_v44 = vadd.f32 %v941_v15, %v2202_v1 }
  0x68   : > { %v2386_v59 = vpop.eup %1906  ;;  %v1031_v40 = vsel %vm521_vm0, %v1009_v61, 0.0  ;;  %v2390_v45 = vmul.f32 %v1905_v35, %v2308_v0  ;;  %v985_v9 = vadd.f32 %v943_v49, %v2204_v2  ;;  %v788_v53 = vadd.f32 %v787_v19, %v786_v43 }
  0x69   : > { %v1909_v48 = vpop.eup %1908  ;;  %1171 = vadd.xlane.f32.xlu1 %v1170_v28  ;;  %v1032_v5 = vadd.f32 %v1031_v40, %v1030_v12  ;;  %v1173_v24 = vsel %vm521_vm0, %v2383_v22, 0.0  ;;  %v1471_v54 = vsub.f32 %v2256_v63, %v984_v44  ;;  %v794_v38 = vrot.slane %v793_v8, 2 }
  0x6a   : > { %v1174_v1 = vsel %vm521_vm0, %v2390_v45, 0.0  ;;  %v1472_v42 = vsub.f32 %v2275_v14, %v985_v9  ;;  %v2400_v0 = vmul.f32 %v1909_v48, %v2316_v26  ;;  %v789_v4 = vrot.slane %v788_v53, 1 }
  0x6b   : > { %1033 = vadd.xlane.f32.xlu0 %v1032_v5  ;;  %v1175_v2 = vadd.f32 %v1174_v1, %v1173_v24  ;;  %v795_v43 = vadd.f32 %v794_v38, %v793_v8  ;;  %v798_v19 = vsel %vm521_vm0, %v2386_v59, 0.0  ;;  %v2404_v15 = vmax.f32 %v596_v27, %v597_v51 }
  0x6c   : > { %v2406_v21 = vpop.eup %1910  ;;  %v1515_v63 = vsel %vm1142_vm3, %v1472_v42, %v1471_v54  ;;  %v1178_v61 = vsel %vm521_vm0, %v2400_v0, 0.0  ;;  %v2411_v14 = vadd.f32 %v789_v4, %v788_v53  ;;  %v799_v26 = vrot.slane %v798_v19, 4 }
  0x6d   : > { %1176 = vadd.xlane.f32.xlu1 %v1175_v2  ;;  %v1538_v49 = vsel %vm1537_vm4, %v1515_v63, 0.0  ;;  %v796_v35 = vrot.slane %v795_v43, 1  ;;  %v805_v8 = vsel %vm521_vm0, %v2406_v21, 0.0  ;;  %v604_v28 = vrot.slane %v603_v57, 1 }
  0x6e   : > { %1914 = vrcp.f32 %v2411_v14  ;;  %v800_v27 = vadd.f32 %v799_v26, %v798_v19  ;;  %v806_v51 = vrot.slane %v805_v8, 4  ;;  %v686_v12 = vsub.f32 %v2273_v13, %v2404_v15 }
  0x6f   : > { %1539 = vadd.xlane.f32.xlu0 %v1538_v49  ;;  %v2419_v44 = vadd.f32 %v796_v35, %v795_v43  ;;  %v2421_v40 = vmax.f32 %v603_v57, %v604_v28  ;;  %v609_v9 = vrot.slane %v2374_v11, 2  ;;  %v614_v53 = vrot.slane %v2362_v10, 4 }
  0x70   : > { %v1913_v48 = vpop.eup %1912  ;;  %v801_v5 = vrot.slane %v800_v27, 2  ;;  %v807_v24 = vadd.f32 %v806_v51, %v805_v8  ;;  %v718_v54 = vmul.f32 1.442695, %v686_v12  ;;  %v2427_v38 = vsub.f32 %v2144_v18, %v2225_v34 }
  0x71   : > { %v2430_v1 = vmul.f32 %v1913_v48, %v2326_v16  ;;  %1916 = vrcp.f32 %v2419_v44  ;;  %v687_v57 = vsub.f32 %v2283_v20, %v2421_v40  ;;  %v610_v42 = vmax.f32 %v2374_v11, %v609_v9 }
  0x72   : > { %3058 = vst [vmem:[#allocation18_spill] sm:$0xff] %v2427_v38  ;;  %v802_v4 = vadd.f32 %v801_v5, %v800_v27  ;;  %v808_v2 = vrot.slane %v807_v24, 2  ;;  %1918 = vpow2.f32 %v718_v54  ;;  %v615_v43 = vmax.f32 %v2362_v10, %v614_v53 }
  0x73   : > { %v1179_v19 = vsel %vm521_vm0, %v2430_v1, 0.0  ;;  %v720_v34 = vmul.f32 1.442695, %v687_v57  ;;  %v611_v63 = vrot.slane %v610_v42, 1  ;;  %v634_v16 = vsel %vm521_vm0, %v2366_v37, -inf }
  0x74   : > { %v1180_v26 = vadd.f32 %v1179_v19, %v1178_v61  ;;  %v803_v49 = vrot.slane %v802_v4, 1  ;;  %v809_v35 = vadd.f32 %v808_v2, %v807_v24  ;;  %v616_v8 = vrot.slane %v615_v43, 2 }
  0x75   : > { %1920 = vpow2.f32 %v720_v34  ;;  %v2441_v28 = vmax.f32 %v610_v42, %v611_v63  ;;  %v635_v11 = vrot.slane %v634_v16, 4  ;;  %v641_v27 = vsel %vm521_vm0, %v2427_v38, -inf }
  0x76   : > { %1181 = vadd.xlane.f32.xlu1 %v1180_v26  ;;  %v2445_v10 = vadd.f32 %v803_v49, %v802_v4  ;;  %v810_v51 = vrot.slane %v809_v35, 1  ;;  %v617_v12 = vmax.f32 %v615_v43, %v616_v8  ;;  %v642_v9 = vrot.slane %v641_v27, 4 }
  0x77   : > { %3059 = vst [vmem:[#allocation19_spill] sm:$0xff] %v2441_v28  ;;  %v688_v53 = vsub.f32 %v2175_v32, %v2441_v28  ;;  %v636_v61 = vmax.f32 %v634_v16, %v635_v11  ;;  %v2451_v48 = vsub.f32 %v2142_v17, %v2246_v55  ;;  %v2455_v5 = vsub.f32 %v2144_v18, %v2249_v56 }
  0x78   : > { %v1915_v24 = vpop.eup %1914  ;;  %v2457_v54 = vadd.f32 %v810_v51, %v809_v35  ;;  %1922 = vrcp.f32 %v2445_v10  ;;  %v618_v57 = vrot.slane %v617_v12, 1  ;;  %v643_v42 = vmax.f32 %v641_v27, %v642_v9 }
  0x79   : > { %3060 = vst [vmem:[#allocation20_spill] sm:$0xff] %v2451_v48  ;;  %3061 = vst [vmem:[#allocation21_spill] sm:$0xff] %v2455_v5  ;;  %v2461_v4 = vmul.f32 %v1915_v24, %v2348_v52  ;;  %v722_v2 = vmul.f32 1.442695, %v688_v53  ;;  %v637_v43 = vrot.slane %v636_v61, 2  ;;  %v648_v55 = vsel %vm521_vm0, %v2451_v48, -inf }
  0x7a   : > { %1924 = vrcp.f32 %v2457_v54  ;;  %v2466_v19 = vmax.f32 %v617_v12, %v618_v57  ;;  %v644_v56 = vrot.slane %v643_v42, 2  ;;  %v649_v34 = vrot.slane %v648_v55, 4 }
  0x7b   : > { %v1917_v63 = vpop.eup %1916  ;;  %v1183_v16 = vsel %vm521_vm0, %v2461_v4, 0.0  ;;  %1926 = vpow2.f32 %v722_v2  ;;  %v638_v26 = vmax.f32 %v636_v61, %v637_v43  ;;  %v655_v52 = vsel %vm521_vm0, %v2455_v5, -inf }
  0x7c   : > { %3062 = vst [vmem:[#allocation22_spill] sm:$0xff] %v2466_v19  ;;  %v2472_v49 = vpop.eup %1918  ;;  %v2475_v35 = vmul.f32 %v1917_v63, %v2358_v33  ;;  %v689_v8 = vsub.f32 %v2346_v7, %v2466_v19  ;;  %v645_v11 = vmax.f32 %v643_v42, %v644_v56  ;;  %v650_v27 = vmax.f32 %v648_v55, %v649_v34 }
  0x7d   : > { %v812_v51 = vsel %vm521_vm0, %v2472_v49, 0.0  ;;  %v639_v12 = vrot.slane %v638_v26, 1  ;;  %v656_v9 = vrot.slane %v655_v52, 4  ;;  %v2483_v53 = vsub.f32 %v2142_v17, %v2254_v62 }
  0x7e   : > { %v1184_v61 = vsel %vm521_vm0, %v2475_v35, 0.0  ;;  %v813_v24 = vrot.slane %v812_v51, 4  ;;  %v724_v33 = vmul.f32 1.442695, %v689_v8  ;;  %v646_v57 = vrot.slane %v645_v11, 1 }
  0x7f   : > { %3063 = vst [vmem:[#allocation23_spill] sm:$0xff] %v2483_v53  ;;  %v2487_v2 = vpop.eup %1920  ;;  %v1185_v43 = vadd.f32 %v1184_v61, %v1183_v16  ;;  %v2489_v42 = vmax.f32 %v638_v26, %v639_v12  ;;  %v651_v55 = vrot.slane %v650_v27, 2  ;;  %v657_v56 = vmax.f32 %v655_v52, %v656_v9 }
  0x80   : > { %v814_v34 = vadd.f32 %v813_v24, %v812_v51  ;;  %v819_v63 = vsel %vm521_vm0, %v2487_v2, 0.0  ;;  %1928 = vpow2.f32 %v724_v33  ;;  %v2493_v62 = vmax.f32 %v645_v11, %v646_v57 }
  0x81   : > { %3064 = vst [vmem:[#allocation24_spill] sm:$0xff] %v2489_v42  ;;  %1186 = vadd.xlane.f32.xlu0 %v1185_v43  ;;  %v820_v19 = vrot.slane %v819_v63, 4  ;;  %v692_v8 = vsub.f32 %v2366_v37, %v2489_v42  ;;  %v652_v28 = vmax.f32 %v650_v27, %v651_v55  ;;  %v658_v7 = vrot.slane %v657_v56, 2 }
  0x82   : > { %3065 = vst [vmem:[#allocation25_spill] sm:$0xff] %v2493_v62  ;;  %v1923_v32 = vpop.eup %1922  ;;  %v815_v16 = vrot.slane %v814_v34, 2  ;;  %v693_v26 = vsub.f32 %v2427_v38, %v2493_v62  ;;  %v2501_v52 = vsub.f32 %v2144_v18, %v2259_v6  ;;  %v662_v11 = vsel %vm521_vm0, %v2483_v53, -inf }
  0x83   : > { %v2506_v51 = vmul.f32 %v1923_v32, %v2386_v59  ;;  %v821_v12 = vadd.f32 %v820_v19, %v819_v63  ;;  %v730_v9 = vmul.f32 1.442695, %v692_v8  ;;  %v653_v61 = vrot.slane %v652_v28, 1 }
  0x84   : > { %3066 = vst [vmem:[#allocation26_spill] sm:$0xff] %v2501_v52  ;;  %v1925_v27 = vpop.eup %1924  ;;  %v816_v24 = vadd.f32 %v815_v16, %v814_v34  ;;  %v732_v33 = vmul.f32 1.442695, %v693_v26  ;;  %v659_v57 = vmax.f32 %v657_v56, %v658_v7  ;;  %v663_v43 = vrot.slane %v662_v11, 4 }
  0x85   : > { %v2508_v55 = vpop.eup %1926  ;;  %v2511_v62 = vmul.f32 %v1925_v27, %v2406_v21  ;;  %v1188_v6 = vsel %vm521_vm0, %v2506_v51, 0.0  ;;  %v822_v42 = vrot.slane %v821_v12, 2  ;;  %1930 = vpow2.f32 %v730_v9 }
  0x86   : > { %v817_v32 = vrot.slane %v816_v24, 1  ;;  %v826_v59 = vsel %vm521_vm0, %v2508_v55, 0.0  ;;  %1932 = vpow2.f32 %v732_v33  ;;  %v2517_v19 = vmax.f32 %v652_v28, %v653_v61 }
  0x87   : > { %v1189_v7 = vsel %vm521_vm0, %v2511_v62, 0.0  ;;  %v823_v56 = vadd.f32 %v822_v42, %v821_v12  ;;  %v827_v34 = vrot.slane %v826_v59, 4  ;;  %v660_v63 = vrot.slane %v659_v57, 1 }
  0x88   : > { %3067 = vst [vmem:[#allocation27_spill] sm:$0xff] %v2517_v19  ;;  %v1190_v21 = vadd.f32 %v1189_v7, %v1188_v6  ;;  %v2521_v8 = vadd.f32 %v817_v32, %v816_v24  ;;  %v694_v16 = vsub.f32 %v2451_v48, %v2517_v19  ;;  %v664_v26 = vmax.f32 %v662_v11, %v663_v43 }
  0x89   : > { %v824_v9 = vrot.slane %v823_v56, 1  ;;  %v828_v27 = vadd.f32 %v827_v34, %v826_v59  ;;  %v2525_v38 = vmax.f32 %v659_v57, %v660_v63  ;;  %v669_v28 = vsel %vm521_vm0, %v2501_v52, -inf }
  0x8a   : > { %v2529_v61 = vpop.eup %1928  ;;  %1191 = vadd.xlane.f32.xlu1 %v1190_v21  ;;  %1934 = vrcp.f32 %v2521_v8  ;;  %v734_v42 = vmul.f32 1.442695, %v694_v16  ;;  %v665_v12 = vrot.slane %v664_v26, 2  ;;  %v670_v24 = vrot.slane %v669_v28, 4 }
  0x8b   : > { %3068 = vst [vmem:[#allocation28_spill] sm:$0xff] %v2525_v38  ;;  %v2532_v33 = vadd.f32 %v824_v9, %v823_v56  ;;  %v829_v6 = vrot.slane %v828_v27, 2  ;;  %v833_v11 = vsel %vm521_vm0, %v2529_v61, 0.0  ;;  %v695_v57 = vsub.f32 %v2455_v5, %v2525_v38 }
  0x8c   : > { %v834_v43 = vrot.slane %v833_v11, 4  ;;  %1936 = vpow2.f32 %v734_v42  ;;  %v666_v32 = vmax.f32 %v664_v26, %v665_v12  ;;  %v671_v59 = vmax.f32 %v669_v28, %v670_v24 }
  0x8d   : > { %1938 = vrcp.f32 %v2532_v33  ;;  %v830_v7 = vadd.f32 %v829_v6, %v828_v27  ;;  %v736_v34 = vmul.f32 1.442695, %v695_v57  ;;  %v2541_v63 = vsub.f32 %v2142_v17, %v2169_v30 }
  0x8e   : > { %v835_v56 = vadd.f32 %v834_v43, %v833_v11  ;;  %v667_v21 = vrot.slane %v666_v32, 1  ;;  %v672_v16 = vrot.slane %v671_v59, 2  ;;  %v2545_v9 = vsub.f32 %v2144_v18, %v2172_v31 }
  0x8f   : > { %v2547_v38 = vpop.eup %1930  ;;  %v831_v42 = vrot.slane %v830_v7, 1  ;;  %1940 = vpow2.f32 %v736_v34  ;;  %v620_v26 = vsel %vm521_vm0, %v2541_v63, -inf  ;;  %v2553_v27 = vmul.f32 %v2198_v60, %v2383_v22 }
  0x90   : > { %v2555_v17 = vpop.eup %1932  ;;  %v836_v30 = vrot.slane %v835_v56, 2  ;;  %v854_v28 = vsel %vm521_vm0, %v2547_v38, 0.0  ;;  %v2559_v12 = vmax.f32 %v666_v32, %v667_v21  ;;  %v673_v18 = vmax.f32 %v671_v59, %v672_v16 }
  0x91   : > { %v2561_v31 = vadd.f32 %v831_v42, %v830_v7  ;;  %v855_v24 = vrot.slane %v854_v28, 4  ;;  %v861_v6 = vsel %vm521_vm0, %v2555_v17, 0.0  ;;  %v621_v11 = vrot.slane %v620_v26, 4 }
  0x92   : > { %3069 = vst [vmem:[#allocation29_spill] sm:$0xff] %v2559_v12  ;;  %v837_v57 = vadd.f32 %v836_v30, %v835_v56  ;;  %v862_v43 = vrot.slane %v861_v6, 4  ;;  %v674_v22 = vrot.slane %v673_v18, 1  ;;  %v696_v34 = vsub.f32 %v2483_v53, %v2559_v12 }
  0x93   : > { %1942 = vrcp.f32 %v2561_v31  ;;  %v856_v19 = vadd.f32 %v855_v24, %v854_v28  ;;  %v622_v5 = vmax.f32 %v620_v26, %v621_v11  ;;  %v627_v32 = vsel %vm521_vm0, %v2545_v9, -inf }
  0x94   : > { %v1935_v59 = vpop.eup %1934  ;;  %v838_v7 = vrot.slane %v837_v57, 1  ;;  %v863_v21 = vadd.f32 %v862_v43, %v861_v6  ;;  %v2570_v16 = vmax.f32 %v673_v18, %v674_v22  ;;  %v738_v42 = vmul.f32 1.442695, %v696_v34 }
  0x95   : > { %v2573_v56 = vmul.f32 %v1935_v59, %v2472_v49  ;;  %v857_v30 = vrot.slane %v856_v19, 2  ;;  %v623_v48 = vrot.slane %v622_v5, 2  ;;  %v628_v37 = vrot.slane %v627_v32, 4 }
  0x96   : > { %3070 = vst [vmem:[#allocation30_spill] sm:$0xff] %v2570_v16  ;;  %v2575_v12 = vpop.eup %1936  ;;  %v2577_v53 = vadd.f32 %v838_v7, %v837_v57  ;;  %v864_v26 = vrot.slane %v863_v21, 2  ;;  %v697_v28 = vsub.f32 %v2501_v52, %v2570_v16  ;;  %1944 = vpow2.f32 %v738_v42 }
  0x97   : > { %v1939_v24 = vpop.eup %1938  ;;  %v1193_v18 = vsel %vm521_vm0, %v2573_v56, 0.0  ;;  %v858_v6 = vadd.f32 %v857_v30, %v856_v19  ;;  %v868_v49 = vsel %vm521_vm0, %v2575_v12, 0.0  ;;  %v624_v11 = vmax.f32 %v622_v5, %v623_v48 }
  0x98   : > { %3071 = vst [vmem:[#allocation31_spill] sm:$0xff] %v2577_v53  ;;  %v2586_v43 = vmul.f32 %v1939_v24, %v2487_v2  ;;  %1946 = vrcp.f32 %v2577_v53  ;;  %v865_v57 = vadd.f32 %v864_v26, %v863_v21  ;;  %v869_v22 = vrot.slane %v868_v49, 4 }
  0x99   : > { %v2589_v34 = vpop.eup %1940  ;;  %v859_v59 = vrot.slane %v858_v6, 1  ;;  %v740_v7 = vmul.f32 1.442695, %v697_v28  ;;  %v625_v42 = vrot.slane %v624_v11, 1  ;;  %v629_v16 = vmax.f32 %v627_v32, %v628_v37 }
  0x9a   : > { %v1194_v19 = vsel %vm521_vm0, %v2586_v43, 0.0  ;;  %v866_v30 = vrot.slane %v865_v57, 1  ;;  %v870_v52 = vadd.f32 %v869_v22, %v868_v49  ;;  %v875_v48 = vsel %vm521_vm0, %v2589_v34, 0.0 }
  0x9b   : > { %v1195_v5 = vadd.f32 %v1194_v19, %v1193_v18  ;;  %v2595_v2 = vadd.f32 %v859_v59, %v858_v6  ;;  %v876_v24 = vrot.slane %v875_v48, 4  ;;  %1948 = vpow2.f32 %v740_v7 }
  0x9c   : > { %v2597_v21 = vadd.f32 %v866_v30, %v865_v57  ;;  %v871_v26 = vrot.slane %v870_v52, 2  ;;  %v2599_v53 = vmax.f32 %v624_v11, %v625_v42  ;;  %v630_v28 = vrot.slane %v629_v16, 2 }
  0x9d   : > { %v1943_v37 = vpop.eup %1942  ;;  %1196 = vadd.xlane.f32.xlu0 %v1195_v5  ;;  %1950 = vrcp.f32 %v2595_v2  ;;  %v877_v32 = vadd.f32 %v876_v24, %v875_v48  ;;  %v1011_v49 = vmul.f32 %v2207_v3, %v2390_v45  ;;  %v1035_v18 = vsel %vm521_vm0, %v2553_v27, 0.0 }
  0x9e   : > { %v2607_v6 = vmul.f32 %v1943_v37, %v2508_v55  ;;  %1952 = vrcp.f32 %v2597_v21  ;;  %v872_v57 = vadd.f32 %v871_v26, %v870_v52  ;;  %v631_v11 = vmax.f32 %v629_v16, %v630_v28 }
  0x9f   : > { %v878_v22 = vrot.slane %v877_v32, 2  ;;  %v690_v59 = vsub.f32 %v2541_v63, %v2599_v53  ;;  %v1036_v7 = vsel %vm521_vm0, %v1011_v49, 0.0  ;;  %v1014_v42 = vmul.f32 %v2198_v60, %v2461_v4 }
  0xa0   : > { %v2615_v45 = vpop.eup %1944  ;;  %v1198_v27 = vsel %vm521_vm0, %v2607_v6, 0.0  ;;  %v873_v55 = vrot.slane %v872_v57, 1  ;;  %v632_v19 = vrot.slane %v631_v11, 1  ;;  %v2619_v30 = vadd.f32 %v1036_v7, %v1035_v18 }
  0xa1   : > { %v879_v52 = vadd.f32 %v878_v22, %v877_v32  ;;  %v882_v16 = vsel %vm521_vm0, %v2615_v45, 0.0  ;;  %v726_v48 = vmul.f32 1.442695, %v690_v59  ;;  %v1015_v5 = vmul.f32 %v2207_v3, %v2475_v35 }
  0xa2   : > { %v1947_v24 = vpop.eup %1946  ;;  %v2625_v26 = vadd.f32 %v873_v55, %v872_v57  ;;  %v883_v4 = vrot.slane %v882_v16, 4  ;;  %v2627_v28 = vmax.f32 %v631_v11, %v632_v19  ;;  %v1045_v37 = vsel %vm521_vm0, %v1014_v42, 0.0 }
  0xa3   : > { %v931_v49 = vmul.f32 %v1947_v24, %v2529_v61  ;;  %v880_v18 = vrot.slane %v879_v52, 1  ;;  %1954 = vpow2.f32 %v726_v48  ;;  %v1046_v32 = vsel %vm521_vm0, %v1015_v5, 0.0 }
  0xa4   : > { %1956 = vrcp.f32 %v2625_v26  ;;  %v884_v22 = vadd.f32 %v883_v4, %v882_v16  ;;  %v691_v35 = vsub.f32 %v2545_v9, %v2627_v28  ;;  %v2635_v59 = vadd.f32 %v1046_v32, %v1045_v37 }
  0xa5   : > { %v2637_v57 = vpop.eup %1948  ;;  %v1199_v11 = vsel %vm521_vm0, %v931_v49, 0.0  ;;  %v2640_v7 = vadd.f32 %v880_v18, %v879_v52  ;;  %v1012_v61 = vmul.f32 %v2198_v60, %v2400_v0  ;;  %v1013_v42 = vmul.f32 %v2207_v3, %v2430_v1 }
  0xa6   : > { %v1200_v55 = vadd.f32 %v1199_v11, %v1198_v27  ;;  %v885_v19 = vrot.slane %v884_v22, 2  ;;  %v889_v16 = vsel %vm521_vm0, %v2637_v57, 0.0  ;;  %v728_v48 = vmul.f32 1.442695, %v691_v35 }
  0xa7   : > { %v1951_v5 = vpop.eup %1950  ;;  %1958 = vrcp.f32 %v2640_v7  ;;  %v890_v24 = vrot.slane %v889_v16, 4  ;;  %v1040_v4 = vsel %vm521_vm0, %v1012_v61, 0.0  ;;  %v1041_v52 = vsel %vm521_vm0, %v1013_v42, 0.0 }
  0xa8   : > { %v1953_v37 = vpop.eup %1952  ;;  %1201 = vadd.xlane.f32.xlu1 %v1200_v55  ;;  %v934_v0 = vmul.f32 %v1951_v5, %v2547_v38  ;;  %v886_v18 = vadd.f32 %v885_v19, %v884_v22  ;;  %1960 = vpow2.f32 %v728_v48  ;;  %v2652_v1 = vadd.f32 %v1041_v52, %v1040_v4 }
  0xa9   : > { %v935_v27 = vmul.f32 %v1953_v37, %v2555_v17  ;;  %v891_v32 = vadd.f32 %v890_v24, %v889_v16  ;;  %v1018_v35 = vmul.f32 %v2198_v60, %v2573_v56  ;;  %v1019_v11 = vmul.f32 %v2207_v3, %v2586_v43 }
  0xaa   : > { %v1208_v61 = vsel %vm521_vm0, %v934_v0, 0.0  ;;  %v887_v42 = vrot.slane %v886_v18, 1  ;;  %v1016_v55 = vmul.f32 %v2198_v60, %v2506_v51  ;;  %v1017_v38 = vmul.f32 %v2207_v3, %v2511_v62 }
  0xab   : > { %v1209_v22 = vsel %vm521_vm0, %v935_v27, 0.0  ;;  %v892_v19 = vrot.slane %v891_v32, 2  ;;  %v1055_v17 = vsel %vm521_vm0, %v1018_v35, 0.0  ;;  %v1056_v56 = vsel %vm521_vm0, %v1019_v11, 0.0 }
  0xac   : > { %v1210_v16 = vadd.f32 %v1209_v22, %v1208_v61  ;;  %v2666_v48 = vadd.f32 %v887_v42, %v886_v18  ;;  %v1050_v43 = vsel %vm521_vm0, %v1016_v55, 0.0  ;;  %v1051_v51 = vsel %vm521_vm0, %v1017_v38, 0.0 }
  0xad   : > { %v2670_v5 = vpop.eup %1954  ;;  %v893_v24 = vadd.f32 %v892_v19, %v891_v32  ;;  %v1024_v4 = vmul.f32 %v2198_v60, %v934_v0  ;;  %v1025_v62 = vmul.f32 %v2207_v3, %v935_v27  ;;  %v2678_v18 = vadd.f32 %v1051_v51, %v1050_v43 }
  0xae   : > { %v1957_v52 = vpop.eup %1956  ;;  %1211 = vadd.xlane.f32.xlu0 %v1210_v16  ;;  %1962 = vrcp.f32 %v2666_v48  ;;  %v840_v37 = vsel %vm521_vm0, %v2670_v5, 0.0  ;;  %v1020_v35 = vmul.f32 %v2198_v60, %v2607_v6  ;;  %v2683_v42 = vadd.f32 %v1056_v56, %v1055_v17 }
  0xaf   : > { %v936_v32 = vmul.f32 %v1957_v52, %v2575_v12  ;;  %v894_v11 = vrot.slane %v893_v24, 1  ;;  %v841_v61 = vrot.slane %v840_v37, 4  ;;  %v1070_v0 = vsel %vm521_vm0, %v1024_v4, 0.0 }
  0xb0   : > { %v1071_v27 = vsel %vm521_vm0, %v1025_v62, 0.0  ;;  %v1021_v55 = vmul.f32 %v2207_v3, %v931_v49  ;;  %1964 = vlog2.f32 %v2332_v41  ;;  %v1060_v12 = vsel %vm521_vm0, %v1020_v35, 0.0 }
  0xb1   : > { %v1959_v38 = vpop.eup %1958  ;;  %v1213_v22 = vsel %vm521_vm0, %v936_v32, 0.0  ;;  %v2690_v19 = vadd.f32 %v894_v11, %v893_v24  ;;  %v842_v6 = vadd.f32 %v841_v61, %v840_v37  ;;  %v1026_v43 = vmul.f32 %v2198_v60, %v936_v32 }
  0xb2   : > { %v2693_v16 = vpop.eup %1960  ;;  %v937_v17 = vmul.f32 %v1959_v38, %v2589_v34  ;;  %v1061_v56 = vsel %vm521_vm0, %v1021_v55, 0.0  ;;  %1966 = vlog2.f32 %v2334_v58  ;;  %v2702_v24 = vadd.f32 %v1071_v27, %v1070_v0 }
  0xb3   : > { %1968 = vrcp.f32 %v2690_v19  ;;  %v843_v41 = vrot.slane %v842_v6, 2  ;;  %v847_v49 = vsel %vm521_vm0, %v2693_v16, 0.0  ;;  %v2705_v62 = vadd.f32 %v1061_v56, %v1060_v12 }
  0xb4   : > { %v1214_v51 = vsel %vm521_vm0, %v937_v17, 0.0  ;;  %v848_v4 = vrot.slane %v847_v49, 4  ;;  %v1027_v34 = vmul.f32 %v2207_v3, %v937_v17  ;;  %v1295_v58 = vmul.f32 %v2198_v60, %v2166_v29 }
  0xb5   : > { %v1215_v52 = vadd.f32 %v1214_v51, %v1213_v22  ;;  %v844_v37 = vadd.f32 %v843_v41, %v842_v6  ;;  %v1296_v35 = vmul.f32 %v2207_v3, %v2179_v36  ;;  %v1075_v11 = vsel %vm521_vm0, %v1026_v43, 0.0 }
  0xb6   : > { %v849_v32 = vadd.f32 %v848_v4, %v847_v49  ;;  %1970 = vlog2.f32 %v2411_v14  ;;  %v1299_v61 = vmul.f32 %v2198_v60, %v2231_v39  ;;  %v1076_v27 = vsel %vm521_vm0, %v1027_v34, 0.0 }
  0xb7   : > { %1216 = vadd.xlane.f32.xlu1 %v1215_v52  ;;  %v845_v0 = vrot.slane %v844_v37, 1  ;;  %v1329_v55 = vsel %vm521_vm0, %v1295_v58, 0.0  ;;  %v1336_v38 = vsel %vm521_vm0, %v1296_v35, 0.0  ;;  %1972 = vlog2.f32 %v2419_v44 }
  0xb8   : > { %v1963_v29 = vpop.eup %1962  ;;  %v850_v22 = vrot.slane %v849_v32, 2  ;;  %v1330_v6 = vrot.slane %v1329_v55, 4  ;;  %v1337_v36 = vrot.slane %v1336_v38, 4  ;;  %v1300_v39 = vmul.f32 %v2207_v3, %v2239_v47 }
  0xb9   : > { %v938_v12 = vmul.f32 %v1963_v29, %v2615_v45  ;;  %v2721_v14 = vadd.f32 %v845_v0, %v844_v37  ;;  %v1357_v17 = vsel %vm521_vm0, %v1299_v61, 0.0  ;;  %vm1148_vm11 = vcmask 1044484  }
  0xba   : > { %v1965_v56 = vpop.eup %1964  ;;  %v851_v43 = vadd.f32 %v850_v22, %v849_v32  ;;  %v1331_v41 = vadd.f32 %v1330_v6, %v1329_v55  ;;  %v1338_v49 = vadd.f32 %v1337_v36, %v1336_v38  ;;  %v1358_v51 = vrot.slane %v1357_v17, 4 }
  0xbb   : > { %v1218_v4 = vsel %vm521_vm0, %v938_v12, 0.0  ;;  %1974 = vrcp.f32 %v2721_v14  ;;  %v945_v34 = vmul.f32 0.6931472, %v1965_v56  ;;  %v1028_v44 = vmul.f32 %v2198_v60, %v938_v12 }
  0xbc   : > { %v1967_v45 = vpop.eup %1966  ;;  %v852_v52 = vrot.slane %v851_v43, 1  ;;  %v1332_v37 = vrot.slane %v1331_v41, 2  ;;  %v1339_v58 = vrot.slane %v1338_v49, 2  ;;  %v1359_v35 = vadd.f32 %v1358_v51, %v1357_v17 }
  0xbd   : > { %v1969_v47 = vpop.eup %1968  ;;  %v947_v0 = vmul.f32 0.6931472, %v1967_v45  ;;  %v986_v61 = vadd.f32 %v945_v34, %v2220_v23  ;;  %v1080_v32 = vsel %vm521_vm0, %v1028_v44, 0.0  ;;  %v1364_v55 = vsel %vm521_vm0, %v1300_v39, 0.0 }
  0xbe   : > { %v939_v38 = vmul.f32 %v1969_v47, %v2637_v57  ;;  %v2733_v29 = vadd.f32 %v852_v52, %v851_v43  ;;  %v1333_v22 = vadd.f32 %v1332_v37, %v1331_v41  ;;  %v1340_v6 = vadd.f32 %v1339_v58, %v1338_v49 }
  0xbf   : > { %v987_v36 = vadd.f32 %v947_v0, %v2222_v25  ;;  %v1360_v12 = vrot.slane %v1359_v35, 2  ;;  %v1365_v56 = vrot.slane %v1364_v55, 4  ;;  %1976 = vlog2.f32 %v2341_v50 }
  0xc0   : > { %v1971_v17 = vpop.eup %1970  ;;  %v1219_v51 = vsel %vm521_vm0, %v939_v38, 0.0  ;;  %1978 = vrcp.f32 %v2733_v29  ;;  %v1334_v23 = vrot.slane %v1333_v22, 1  ;;  %v1341_v34 = vrot.slane %v1340_v6, 1 }
  0xc1   : > { %v1220_v39 = vadd.f32 %v1219_v51, %v1218_v4  ;;  %v1029_v57 = vmul.f32 %v2207_v3, %v939_v38  ;;  %v953_v43 = vmul.f32 0.6931472, %v1971_v17  ;;  %v1361_v44 = vadd.f32 %v1360_v12, %v1359_v35  ;;  %v1973_v41 = vpop.eup %1972  ;;  %v3072_v4 = vld [vmem:[#allocation12_spill] sm:$0xff] }
  0xc2   : > { %v1335_v49 = vadd.f32 %v1334_v23, %v1333_v22  ;;  %v1342_v45 = vadd.f32 %v1341_v34, %v1340_v6  ;;  %v1366_v25 = vadd.f32 %v1365_v56, %v1364_v55  ;;  %1980 = vlog2.f32 %v2372_v46  ;;  %v3073_v6 = vld [vmem:[#allocation6_spill] sm:$0xff]  ;;  %v3074_v46 = vld [vmem:[#allocation7_spill] sm:$0xff] }
  0xc3   : > { %1221 = vadd.xlane.f32.xlu0 %v1220_v39  ;;  %v2741_v50 = vadd.f32 %v1076_v27, %v1075_v11  ;;  %v1081_v52 = vsel %vm521_vm0, %v1029_v57, 0.0  ;;  %v955_v37 = vmul.f32 0.6931472, %v1973_v41  ;;  %v1362_v58 = vrot.slane %v1361_v44, 1 }
  0xc4   : > { %v1473_v47 = vsub.f32 %v1335_v49, %v986_v61  ;;  %v1474_v0 = vsub.f32 %v1342_v45, %v987_v36  ;;  %v990_v51 = vadd.f32 %v953_v43, %v3072_v4  ;;  %v1367_v38 = vrot.slane %v1366_v25, 2 }
  0xc5   : > { %v1975_v17 = vpop.eup %1974  ;;  %v2745_v35 = vadd.f32 %v1081_v52, %v1080_v32  ;;  %v1363_v22 = vadd.f32 %v1362_v58, %v1361_v44  ;;  %v1297_v55 = vmul.f32 %v2198_v60, %v3073_v6  ;;  %v1298_v11 = vmul.f32 %v2207_v3, %v3074_v46  ;;  %v3075_v32 = vld [vmem:[#allocation13_spill] sm:$0xff]  ;;  %v3076_v46 = vld [vmem:[#allocation8_spill] sm:$0xff] }
  0xc6   : > { %v932_v27 = vmul.f32 %v1975_v17, %v2670_v5  ;;  %v1516_v12 = vsel %vm1142_vm3, %v1474_v0, %v1473_v47  ;;  %v1368_v56 = vadd.f32 %v1367_v38, %v1366_v25  ;;  %1982 = vlog2.f32 %v2521_v8 }
  0xc7   : > { %1038 = vadd.xlane.f32.xlu0 %v2619_v30  ;;  %v2756_v61 = vsel %vm1537_vm4, %v1516_v12, 0.0  ;;  %v991_v36 = vadd.f32 %v955_v37, %v3075_v32  ;;  %v1343_v23 = vsel %vm521_vm0, %v1297_v55, 0.0  ;;  %v1350_v34 = vsel %vm521_vm0, %v1298_v11, 0.0  ;;  %v3077_v32 = vld [vmem:[#allocation11_spill] sm:$0xff] }
  0xc8   : > { %v1022_v39 = vmul.f32 %v2198_v60, %v932_v27  ;;  %v1369_v57 = vrot.slane %v1368_v56, 1  ;;  %v1477_v5 = vsub.f32 %v1363_v22, %v990_v51  ;;  %v1344_v43 = vrot.slane %v1343_v23, 4 }
  0xc9   : > { %v1977_v44 = vpop.eup %1976  ;;  %v1351_v41 = vrot.slane %v1350_v34, 4  ;;  %1984 = vlog2.f32 %v2532_v33  ;;  %v1303_v8 = vmul.f32 %v2198_v60, %v2273_v13  ;;  %v1304_v30 = vmul.f32 %v2207_v3, %v2283_v20 }
  0xca   : > { %v1979_v49 = vpop.eup %1978  ;;  %v1203_v45 = vsel %vm521_vm0, %v932_v27, 0.0  ;;  %v1370_v25 = vadd.f32 %v1369_v57, %v1368_v56  ;;  %v949_v52 = vmul.f32 0.6931472, %v1977_v44  ;;  %v1345_v37 = vadd.f32 %v1344_v43, %v1343_v23 }
  0xcb   : > { %v933_v58 = vmul.f32 %v1979_v49, %v2693_v16  ;;  %1043 = vadd.xlane.f32.xlu0 %v2652_v1  ;;  %v1065_v47 = vsel %vm521_vm0, %v1022_v39, 0.0  ;;  %v1352_v0 = vadd.f32 %v1351_v41, %v1350_v34  ;;  %v1385_v33 = vsel %vm521_vm0, %v1303_v8, 0.0 }
  0xcc   : > { %v1981_v4 = vpop.eup %1980  ;;  %v1478_v13 = vsub.f32 %v1370_v25, %v991_v36  ;;  %v1346_v51 = vrot.slane %v1345_v37, 2  ;;  %v1386_v38 = vrot.slane %v1385_v33, 4  ;;  %v1392_v20 = vsel %vm521_vm0, %v1304_v30, 0.0 }
  0xcd   : > { %v1204_v17 = vsel %vm521_vm0, %v933_v58, 0.0  ;;  %v1023_v22 = vmul.f32 %v2207_v3, %v933_v58  ;;  %v951_v6 = vmul.f32 0.6931472, %v1981_v4  ;;  %v1353_v55 = vrot.slane %v1352_v0, 2  ;;  %v3079_v58 = vld [vmem:[#allocation10_spill] sm:$0xff] }
  0xce   : > { %v1205_v16 = vadd.f32 %v1204_v17, %v1203_v45  ;;  %v988_v1 = vadd.f32 %v949_v52, %v3076_v46  ;;  %v1347_v11 = vadd.f32 %v1346_v51, %v1345_v37  ;;  %v1387_v27 = vadd.f32 %v1386_v38, %v1385_v33 }
  0xcf   : > { %1053 = vadd.xlane.f32.xlu0 %v2678_v18  ;;  %v1066_v12 = vsel %vm521_vm0, %v1023_v22, 0.0  ;;  %v2779_v56 = vsel %vm1142_vm3, %v1478_v13, %v1477_v5  ;;  %v989_v36 = vadd.f32 %v951_v6, %v3077_v32  ;;  %v1354_v23 = vadd.f32 %v1353_v55, %v1352_v0  ;;  %v3078_v18 = vld [vmem:[#allocation9_spill] sm:$0xff] }
  0xd0   : > { %v1983_v34 = vpop.eup %1982  ;;  %1206 = vadd.xlane.f32.xlu1 %v1205_v16  ;;  %v2782_v39 = vadd.f32 %v1066_v12, %v1065_v47  ;;  %v1348_v57 = vrot.slane %v1347_v11, 1  ;;  %v1388_v43 = vrot.slane %v1387_v27, 2  ;;  %v1393_v44 = vrot.slane %v1392_v20, 4  ;;  %v3080_v6 = vld [vmem:[#allocation17_spill] sm:$0xff] }
  0xd1   : > { %v1355_v41 = vrot.slane %v1354_v23, 1  ;;  %v961_v8 = vmul.f32 0.6931472, %v1983_v34  ;;  %1986 = vlog2.f32 %v2445_v10  ;;  %v1301_v30 = vmul.f32 %v2198_v60, %v3078_v18 }
  0xd2   : > { %v1349_v49 = vadd.f32 %v1348_v57, %v1347_v11  ;;  %v1389_v5 = vadd.f32 %v1388_v43, %v1387_v27  ;;  %v1394_v45 = vadd.f32 %v1393_v44, %v1392_v20  ;;  %1988 = vlog2.f32 %v2457_v54  ;;  %v3081_v11 = vld [vmem:[#allocation18_spill] sm:$0xff]  ;;  %v3083_v57 = vld [vmem:[#allocation5_spill] sm:$0xff]  ;;  %v3084_v44 = vld [vmem:[#allocation16_spill] sm:$0xff] }
  0xd3   : > { %v1985_v25 = vpop.eup %1984  ;;  %1063 = vadd.xlane.f32.xlu0 %v2705_v62  ;;  %v1356_v52 = vadd.f32 %v1355_v41, %v1354_v23  ;;  %v994_v37 = vadd.f32 %v961_v8, %v2404_v15  ;;  %v1302_v47 = vmul.f32 %v2207_v3, %v3079_v58  ;;  %v1371_v0 = vsel %vm521_vm0, %v1301_v30, 0.0 }
  0xd4   : > { %1048 = vadd.xlane.f32.xlu1 %v2635_v59  ;;  %v1475_v10 = vsub.f32 %v1349_v49, %v988_v1  ;;  %v963_v33 = vmul.f32 0.6931472, %v1985_v25  ;;  %v1390_v4 = vrot.slane %v1389_v5, 1  ;;  %v1395_v13 = vrot.slane %v1394_v45, 2 }
  0xd5   : > { %v1476_v51 = vsub.f32 %v1356_v52, %v989_v36  ;;  %v1372_v38 = vrot.slane %v1371_v0, 4  ;;  %v1378_v54 = vsel %vm521_vm0, %v1302_v47, 0.0  ;;  %1990 = vlog2.f32 %v2595_v2  ;;  %v3082_v36 = vld [vmem:[#allocation31_spill] sm:$0xff] }
  0xd6   : > { %v995_v62 = vadd.f32 %v963_v33, %v2421_v40  ;;  %v1391_v15 = vadd.f32 %v1390_v4, %v1389_v5  ;;  %v1396_v20 = vadd.f32 %v1395_v13, %v1394_v45  ;;  %v1379_v17 = vrot.slane %v1378_v54, 4 }
  0xd7   : > { %1078 = vadd.xlane.f32.xlu0 %v2741_v50  ;;  %v1517_v22 = vsel %vm1142_vm3, %v1476_v51, %v1475_v10  ;;  %v1373_v59 = vadd.f32 %v1372_v38, %v1371_v0  ;;  %1992 = vlog2.f32 %v2597_v21  ;;  %v1309_v55 = vmul.f32 %v2198_v60, %v3080_v6 }
  0xd8   : > { %1058 = vadd.xlane.f32.xlu1 %v2683_v42  ;;  %v1544_v16 = vsel %vm1537_vm4, %v1517_v22, 0.0  ;;  %v1397_v2 = vrot.slane %v1396_v20, 1  ;;  %v1481_v46 = vsub.f32 %v1391_v15, %v994_v37  ;;  %v1380_v40 = vadd.f32 %v1379_v17, %v1378_v54  ;;  %v3085_v37 = vld [vmem:[#allocation14_spill] sm:$0xff] }
  0xd9   : > { %v1374_v1 = vrot.slane %v1373_v59, 2  ;;  %v1310_v27 = vmul.f32 %v2207_v3, %v3081_v11  ;;  %v1427_v50 = vsel %vm521_vm0, %v1309_v55, 0.0  ;;  %1994 = vlog2.f32 %v2561_v31  ;;  %v3087_v55 = vld [vmem:[#allocation24_spill] sm:$0xff] }
  0xda   : > { %v1398_v12 = vadd.f32 %v1397_v2, %v1396_v20  ;;  %v1381_v21 = vrot.slane %v1380_v40, 2  ;;  %v1428_v32 = vrot.slane %v1427_v50, 4  ;;  %1996 = vlog2.f32 %v3082_v36 }
  0xdb   : > { %v1987_v23 = vpop.eup %1986  ;;  %1083 = vadd.xlane.f32.xlu0 %v2745_v35  ;;  %v1375_v42 = vadd.f32 %v1374_v1, %v1373_v59  ;;  %v1434_v34 = vsel %vm521_vm0, %v1310_v27, 0.0  ;;  %v1305_v43 = vmul.f32 %v2198_v60, %v3083_v57  ;;  %v1306_v41 = vmul.f32 %v2207_v3, %v3084_v44  ;;  %v3089_v44 = vld [vmem:[#allocation19_spill] sm:$0xff] }
  0xdc   : > { %v1989_v8 = vpop.eup %1988  ;;  %1073 = vadd.xlane.f32.xlu1 %v2702_v24  ;;  %v1482_v31 = vsub.f32 %v1398_v12, %v995_v62  ;;  %v957_v18 = vmul.f32 0.6931472, %v1987_v23  ;;  %v1382_v30 = vadd.f32 %v1381_v21, %v1380_v40  ;;  %v1429_v49 = vadd.f32 %v1428_v32, %v1427_v50  ;;  %v3086_v24 = vld [vmem:[#allocation15_spill] sm:$0xff]  ;;  %v3088_v32 = vld [vmem:[#allocation25_spill] sm:$0xff] }
  0xdd   : > { %v959_v5 = vmul.f32 0.6931472, %v1989_v8  ;;  %v1376_v45 = vrot.slane %v1375_v42, 1  ;;  %v1435_v25 = vrot.slane %v1434_v34, 4  ;;  %v1399_v35 = vsel %vm521_vm0, %v1305_v43, 0.0 }
  0xde   : > { %v1520_v52 = vsel %vm1142_vm3, %v1482_v31, %v1481_v46  ;;  %v992_v58 = vadd.f32 %v957_v18, %v3085_v37  ;;  %v1383_v47 = vrot.slane %v1382_v30, 1  ;;  %v1430_v0 = vrot.slane %v1429_v49, 2 }
  0xdf   : > { %v1991_v10 = vpop.eup %1990  ;;  %v1547_v33 = vsel %vm1537_vm4, %v2779_v56, 0.0  ;;  %1545 = vadd.xlane.f32.xlu0 %v1544_v16  ;;  %v993_v4 = vadd.f32 %v959_v5, %v3086_v24  ;;  %v1377_v13 = vadd.f32 %v1376_v45, %v1375_v42  ;;  %v1436_v51 = vadd.f32 %v1435_v25, %v1434_v34  ;;  %v3092_v24 = vld [vmem:[#allocation22_spill] sm:$0xff] }
  0xe0   : > { %1068 = vadd.xlane.f32.xlu1 %v2782_v39  ;;  %v1384_v38 = vadd.f32 %v1383_v47, %v1382_v30  ;;  %v973_v54 = vmul.f32 0.6931472, %v1991_v10  ;;  %v1431_v62 = vadd.f32 %v1430_v0, %v1429_v49  ;;  %v1400_v15 = vrot.slane %v1399_v35, 4  ;;  %v3090_v49 = vld [vmem:[#allocation20_spill] sm:$0xff] }
  0xe1   : > { %v1993_v20 = vpop.eup %1992  ;;  %v1479_v17 = vsub.f32 %v1377_v13, %v992_v58  ;;  %v1437_v22 = vrot.slane %v1436_v51, 2  ;;  %v1406_v59 = vsel %vm521_vm0, %v1306_v41, 0.0  ;;  %1998 = vlog2.f32 %v2721_v14  ;;  %v3091_v58 = vld [vmem:[#allocation21_spill] sm:$0xff] }
  0xe2   : > { %v1480_v6 = vsub.f32 %v1384_v38, %v993_v4  ;;  %v975_v56 = vmul.f32 0.6931472, %v1993_v20  ;;  %v1000_v16 = vadd.f32 %v973_v54, %v3087_v55  ;;  %v1432_v2 = vrot.slane %v1431_v62, 1 }
  0xe3   : > { %v1995_v46 = vpop.eup %1994  ;;  %v1438_v40 = vadd.f32 %v1437_v22, %v1436_v51  ;;  %v1401_v1 = vadd.f32 %v1400_v15, %v1399_v35  ;;  %v1407_v39 = vrot.slane %v1406_v59, 4  ;;  %2000 = vlog2.f32 %v2733_v29 }
  0xe4   : > { %v1997_v11 = vpop.eup %1996  ;;  %1542 = vadd.xlane.f32.xlu1 %v2756_v61  ;;  %v1553_v27 = vsel %vm1537_vm4, %v1520_v52, 0.0  ;;  %v1519_v50 = vsel %vm1142_vm3, %v1480_v6, %v1479_v17  ;;  %v1433_v12 = vadd.f32 %v1432_v2, %v1431_v62  ;;  %v965_v14 = vmul.f32 0.6931472, %v1995_v46 }
  0xe5   : > { %v1550_v21 = vsel %vm1537_vm4, %v1519_v50, 0.0  ;;  %v1001_v36 = vadd.f32 %v975_v56, %v3088_v32  ;;  %v1439_v23 = vrot.slane %v1438_v40, 1  ;;  %v1402_v42 = vrot.slane %v1401_v1, 2 }
  0xe6   : > { %1551 = vadd.xlane.f32.xlu0 %v1550_v21  ;;  %v1487_v34 = vsub.f32 %v1433_v12, %v1000_v16  ;;  %v967_v57 = vmul.f32 0.6931472, %v1997_v11  ;;  %v1408_v43 = vadd.f32 %v1407_v39, %v1406_v59  ;;  %v1307_v29 = vmul.f32 %v2198_v60, %v2541_v63 }
  0xe7   : > { %v1440_v61 = vadd.f32 %v1439_v23, %v1438_v40  ;;  %v996_v41 = vadd.f32 %v965_v14, %v3089_v44  ;;  %v1403_v8 = vadd.f32 %v1402_v42, %v1401_v1  ;;  %v1308_v31 = vmul.f32 %v2207_v3, %v2545_v9  ;;  %v3095_v44 = vld [vmem:[#allocation27_spill] sm:$0xff] }
  0xe8   : > { %1548 = vadd.xlane.f32.xlu1 %v1547_v33  ;;  %v1409_v18 = vrot.slane %v1408_v43, 2  ;;  %v1413_v30 = vsel %vm521_vm0, %v1307_v29, 0.0  ;;  %2002 = vlog2.f32 %v2625_v26  ;;  %v1311_v5 = vmul.f32 %v2198_v60, %v3090_v49  ;;  %v3096_v49 = vld [vmem:[#allocation28_spill] sm:$0xff] }
  0xe9   : > { %v1488_v45 = vsub.f32 %v1440_v61, %v1001_v36  ;;  %v1404_v25 = vrot.slane %v1403_v8, 1  ;;  %v1414_v35 = vrot.slane %v1413_v30, 4  ;;  %v1420_v63 = vsel %vm521_vm0, %v1308_v31, 0.0 }
  0xea   : > { %v1410_v52 = vadd.f32 %v1409_v18, %v1408_v43  ;;  %v1421_v37 = vrot.slane %v1420_v63, 4  ;;  %2004 = vlog2.f32 %v2640_v7  ;;  %v1312_v9 = vmul.f32 %v2207_v3, %v3091_v58 }
  0xeb   : > { %v1999_v47 = vpop.eup %1998  ;;  %v1523_v0 = vsel %vm1142_vm3, %v1488_v45, %v1487_v34  ;;  %v1405_v10 = vadd.f32 %v1404_v25, %v1403_v8  ;;  %v1415_v26 = vadd.f32 %v1414_v35, %v1413_v30  ;;  %v1441_v33 = vsel %vm521_vm0, %v1311_v5, 0.0 }
  0xec   : > { %1554 = vadd.xlane.f32.xlu1 %v1553_v27  ;;  %v997_v4 = vadd.f32 %v967_v57, %v3092_v24  ;;  %v1411_v13 = vrot.slane %v1410_v52, 1  ;;  %v969_v51 = vmul.f32 0.6931472, %v1999_v47  ;;  %v1422_v38 = vadd.f32 %v1421_v37, %v1420_v63  ;;  %v3093_v27 = vld [vmem:[#allocation23_spill] sm:$0xff] }
  0xed   : > { %v2001_v54 = vpop.eup %2000  ;;  %v1562_v62 = vsel %vm1537_vm4, %v1523_v0, 0.0  ;;  %v1416_v7 = vrot.slane %v1415_v26, 2  ;;  %v1442_v15 = vrot.slane %v1441_v33, 4  ;;  %v1448_v20 = vsel %vm521_vm0, %v1312_v9, 0.0 }
  0xee   : > { %v1412_v17 = vadd.f32 %v1411_v13, %v1410_v52  ;;  %v1483_v22 = vsub.f32 %v1405_v10, %v996_v41  ;;  %v971_v59 = vmul.f32 0.6931472, %v2001_v54  ;;  %v1423_v6 = vrot.slane %v1422_v38, 2 }
  0xef   : > { %v1417_v56 = vadd.f32 %v1416_v7, %v1415_v26  ;;  %v1443_v55 = vadd.f32 %v1442_v15, %v1441_v33  ;;  %v1449_v16 = vrot.slane %v1448_v20, 4  ;;  %2006 = vlog2.f32 %v2666_v48  ;;  %v3094_v48 = vld [vmem:[#allocation26_spill] sm:$0xff] }
  0xf0   : > { %1563 = vadd.xlane.f32.xlu1 %v1562_v62  ;;  %v1484_v2 = vsub.f32 %v1412_v17, %v997_v4  ;;  %v998_v46 = vadd.f32 %v969_v51, %v2599_v53  ;;  %v1424_v40 = vadd.f32 %v1423_v6, %v1422_v38  ;;  %2008 = vlog2.f32 %v2690_v19  ;;  %v3097_v38 = vld [vmem:[#allocation29_spill] sm:$0xff]  ;;  %v3098_v62 = vld [vmem:[#allocation30_spill] sm:$0xff] }
  0xf1   : > { %v1418_v1 = vrot.slane %v1417_v56, 1  ;;  %v1444_v39 = vrot.slane %v1443_v55, 2  ;;  %v1450_v11 = vadd.f32 %v1449_v16, %v1448_v20  ;;  %v1313_v50 = vmul.f32 %v2198_v60, %v3093_v27 }
  0xf2   : > { %v2003_v12 = vpop.eup %2002  ;;  %v1521_v14 = vsel %vm1142_vm3, %v1484_v2, %v1483_v22  ;;  %v999_v21 = vadd.f32 %v971_v59, %v2627_v28  ;;  %v1425_v32 = vrot.slane %v1424_v40, 1  ;;  %v1314_v36 = vmul.f32 %v2207_v3, %v3094_v48 }
  0xf3   : > { %v1556_v53 = vsel %vm1537_vm4, %v1521_v14, 0.0  ;;  %v1419_v23 = vadd.f32 %v1418_v1, %v1417_v56  ;;  %v977_v42 = vmul.f32 0.6931472, %v2003_v12  ;;  %v1445_v19 = vadd.f32 %v1444_v39, %v1443_v55 }
  0xf4   : > { %v2005_v34 = vpop.eup %2004  ;;  %1557 = vadd.xlane.f32.xlu0 %v1556_v53  ;;  %v1426_v57 = vadd.f32 %v1425_v32, %v1424_v40  ;;  %v1451_v43 = vrot.slane %v1450_v11, 2  ;;  %v1455_v60 = vsel %vm521_vm0, %v1313_v50, 0.0  ;;  %v1462_v29 = vsel %vm521_vm0, %v1314_v36, 0.0  ;;  %v3100_v36 = vld [vmem:[#allocation4_spill] sm:$0xff] }
  0xf5   : > { %v1485_v61 = vsub.f32 %v1419_v23, %v998_v46  ;;  %v979_v28 = vmul.f32 0.6931472, %v2005_v34  ;;  %v1002_v41 = vadd.f32 %v977_v42, %v3095_v44  ;;  %v1446_v8 = vrot.slane %v1445_v19, 1 }
  0xf6   : > { %v1486_v3 = vsub.f32 %v1426_v57, %v999_v21  ;;  %v1452_v31 = vadd.f32 %v1451_v43, %v1450_v11  ;;  %v1456_v18 = vrot.slane %v1455_v60, 4  ;;  %v1463_v30 = vrot.slane %v1462_v29, 4  ;;  %v1172_v40 = vpop.xlane.xlu1 %1171 }
  0xf7   : > { %v1003_v5 = vadd.f32 %v979_v28, %v3096_v49  ;;  %v1447_v45 = vadd.f32 %v1446_v8, %v1445_v19  ;;  %v3099_v22 = vmov 0.0   ;;  %v1237_v53 = vrot.slane %v1172_v40, %v3100_v36 }
  0xf8   : > { %v1522_v25 = vsel %vm1142_vm3, %v1486_v3, %v1485_v61  ;;  %v1453_v35 = vrot.slane %v1452_v31, 1  ;;  %v1457_v63 = vadd.f32 %v1456_v18, %v1455_v60  ;;  %v1464_v52 = vadd.f32 %v1463_v30, %v1462_v29  ;;  %445 = vst.msk [vmem:[%s2873_s10 + $0x8] sm:$0x7] %vm442_vm5, %v3099_v22  ;;  %443 = vst.msk [vmem:[%s2879_s12 + $0x8] sm:$0x7] %vm442_vm5, %v3099_v22  ;;  %v1034_v39 = vpop.xlane.xlu0 %1033 }
  0xf9   : > { %v2007_v37 = vpop.eup %2006  ;;  %v1559_v58 = vsel %vm1537_vm4, %v1522_v25, 0.0  ;;  %v1489_v9 = vsub.f32 %v1447_v45, %v1002_v41  ;;  %444 = vst.msk [vmem:[%s2873_s10] sm:$0xff] %vm440_vm6, %v3099_v22  ;;  %441 = vst.msk [vmem:[%s2879_s12] sm:$0xff] %vm440_vm6, %v3099_v22  ;;  %vm1150_vm12 = vcmask 1045509   ;;  %vm1152_vm13 = vcmask 1046534  }
  0xfa   : > { %v2009_v47 = vpop.eup %2008  ;;  %1560 = vadd.xlane.f32.xlu1 %v1559_v58  ;;  %v1454_v0 = vadd.f32 %v1453_v35, %v1452_v31  ;;  %v981_v10 = vmul.f32 0.6931472, %v2007_v37  ;;  %v1458_v26 = vrot.slane %v1457_v63, 2  ;;  %v1465_v33 = vrot.slane %v1464_v52, 2  ;;  %447 = vst.msk [vmem:[%s2902_s15] sm:$0xff] %vm446_vm7, %v3099_v22  ;;  %v1177_v1 = vpop.xlane.xlu1 %1176 }
  0xfb   : > { %v983_v24 = vmul.f32 0.6931472, %v2009_v47  ;;  %449 = vst.msk [vmem:[%s2902_s15 + $0x8] sm:$0x7] %vm448_vm8, %v3099_v22  ;;  %v1241_v23 = vrot.slane %v1177_v1, %v3100_v36  ;;  %vm1154_vm14 = vcmask 1047559  }
  0xfc   : > { %v1490_v4 = vsub.f32 %v1454_v0, %v1003_v5  ;;  %v1459_v13 = vadd.f32 %v1458_v26, %v1457_v63  ;;  %v1466_v51 = vadd.f32 %v1465_v33, %v1464_v52  ;;  %v1004_v54 = vadd.f32 %v981_v10, %v3097_v38  ;;  %v2911_v27 = vpop.xlane.xlu0 %1539 }
  0xfd   : > { %v1005_v7 = vadd.f32 %v983_v24, %v3098_v62  ;;  %v1278_v57 = vsel %vm1142_vm3, %v1241_v23, %v1237_v53  ;;  %v1101_v24 = vrot.slane %v1034_v39, %v3100_v36 }
  0xfe   : > { %v1524_v15 = vsel %vm1142_vm3, %v1490_v4, %v1489_v9  ;;  %v1460_v20 = vrot.slane %v1459_v13, 1  ;;  %v1467_v17 = vrot.slane %v1466_v51, 1 }
  0xff   : > { %v1565_v59 = vsel %vm1537_vm4, %v1524_v15, 0.0  ;;  %v1167_v29 = vld [vmem:[%s2873_s10 + $0x8] sm:$0x7] }
 0x100   : > { %1566 = vadd.xlane.f32.xlu0 %v1565_v59  ;;  %v1461_v6 = vadd.f32 %v1460_v20, %v1459_v13  ;;  %v1468_v56 = vadd.f32 %v1467_v17, %v1466_v51  ;;  %v1166_v52 = vld [vmem:[%s2873_s10] sm:$0xff] }
 0x102   : > { %v1491_v55 = vsub.f32 %v1461_v6, %v1004_v54  ;;  %v1492_v16 = vsub.f32 %v1468_v56, %v1005_v7 }
 0x103   : > { %v1182_v11 = vpop.xlane.xlu1 %1181 }
 0x104   : > { %v1525_v2 = vsel %vm1142_vm3, %v1492_v16, %v1491_v55  ;;  %v1245_v34 = vrot.slane %v1182_v11, %v3100_v36  ;;  %v1007_v16 = vld [vmem:[%s2879_s12 + $0x8] sm:$0x7]  ;;  %v1006_v11 = vld [vmem:[%s2879_s12] sm:$0xff] }
 0x105   : > { %v1568_v46 = vsel %vm1537_vm4, %v1525_v2, 0.0 }
 0x106   : > { %1569 = vadd.xlane.f32.xlu0 %v1568_v46  ;;  %v1279_v44 = vsel %vm1144_vm9, %v1245_v34, %v1278_v57  ;;  %v1585_v57 = vrot.slane %v2911_v27, %v3100_v36 }
 0x10e   : > { %v1187_v12 = vpop.xlane.xlu0 %1186 }
 0x10f   : > { %v1249_v28 = vrot.slane %v1187_v12, %v3100_v36 }
 0x111   : > { %v1280_v18 = vsel %vm1146_vm10, %v1249_v28, %v1279_v44 }
 0x117   : > { %v1192_v50 = vpop.xlane.xlu1 %1191 }
 0x118   : > { %v1253_v31 = vrot.slane %v1192_v50, %v3100_v36 }
 0x11a   : > { %v1281_v5 = vsel %vm1148_vm11, %v1253_v31, %v1280_v18 }
 0x12a   : > { %v1197_v21 = vpop.xlane.xlu0 %1196 }
 0x12b   : > { %v1257_v30 = vrot.slane %v1197_v21, %v3100_v36 }
 0x12d   : > { %v1282_v25 = vsel %vm1150_vm12, %v1257_v30, %v1281_v5 }
 0x135   : > { %v1202_v14 = vpop.xlane.xlu1 %1201 }
 0x136   : > { %v1261_v45 = vrot.slane %v1202_v14, %v3100_v36 }
 0x138   : > { %v1283_v58 = vsel %vm1152_vm13, %v1261_v45, %v1282_v25 }
 0x13b   : > { %v1212_v48 = vpop.xlane.xlu0 %1211 }
 0x13c   : > { %v1269_v19 = vrot.slane %v1212_v48, %v3100_v36 }
 0x144   : > { %v1217_v32 = vpop.xlane.xlu1 %1216 }
 0x145   : > { %v1273_v42 = vrot.slane %v1217_v32, %v3100_v36 }
 0x147   : > { %v1285_v43 = vsel %vm1142_vm3, %v1273_v42, %v1269_v19 }
 0x150   : > { %v1222_v60 = vpop.xlane.xlu0 %1221 }
 0x151   : > { %v1277_v61 = vrot.slane %v1222_v60, %v3100_v36 }
 0x153   : > { %v1286_v41 = vsel %vm1144_vm9, %v1277_v61, %v1285_v43 }
 0x154   : > { %v1290_v8 = vadd.f32 %v1286_v41, %v1167_v29  ;;  %v1039_v3 = vpop.xlane.xlu0 %1038 }
 0x155   : > { %v1105_v47 = vrot.slane %v1039_v3, %v3100_v36 }
 0x156   : > { %1292 = vst.msk [vmem:[%s2873_s10 + $0x8] sm:$0x7] %vm442_vm5, %v1290_v8 }
 0x157   : > { %v1143_v4 = vsel %vm1142_vm3, %v1105_v47, %v1101_v24 }
 0x158   : > { %v1044_v49 = vpop.xlane.xlu0 %1043 }
 0x159   : > { %v1109_v33 = vrot.slane %v1044_v49, %v3100_v36  ;;  %v1469_v49 = vld [vmem:[%s2902_s15] sm:$0xff] }
 0x15b   : > { %v1145_v38 = vsel %vm1144_vm9, %v1109_v33, %v1143_v4 }
 0x15c   : > { %v1054_v35 = vpop.xlane.xlu0 %1053 }
 0x15d   : > { %v1207_v63 = vpop.xlane.xlu1 %1206  ;;  %v1117_v62 = vrot.slane %v1054_v35, %v3100_v36 }
 0x15e   : > { %v1265_v37 = vrot.slane %v1207_v63, %v3100_v36 }
 0x160   : > { %v1284_v9 = vsel %vm1154_vm14, %v1265_v37, %v1283_v58  ;;  %v1064_v0 = vpop.xlane.xlu0 %1063  ;;  %v1470_v58 = vld [vmem:[%s2902_s15 + $0x8] sm:$0x7] }
 0x161   : > { %v1289_v10 = vadd.f32 %v1284_v9, %v1166_v52  ;;  %v1049_v26 = vpop.xlane.xlu1 %1048  ;;  %v1125_v6 = vrot.slane %v1064_v0, %v3100_v36 }
 0x162   : > { %v1113_v13 = vrot.slane %v1049_v26, %v3100_v36 }
 0x163   : > { %1291 = vst.msk [vmem:[%s2873_s10] sm:$0xff] %vm440_vm6, %v1289_v10 }
 0x164   : > { %v1079_v51 = vpop.xlane.xlu0 %1078  ;;  %v1147_v15 = vsel %vm1146_vm10, %v1113_v13, %v1145_v38 }
 0x165   : > { %v1059_v54 = vpop.xlane.xlu1 %1058  ;;  %v1137_v20 = vrot.slane %v1079_v51, %v3100_v36  ;;  %v1149_v22 = vsel %vm1148_vm11, %v1117_v62, %v1147_v15 }
 0x166   : > { %v1121_v7 = vrot.slane %v1059_v54, %v3100_v36 }
 0x168   : > { %v1084_v17 = vpop.xlane.xlu0 %1083  ;;  %v1151_v2 = vsel %vm1150_vm12, %v1121_v7, %v1149_v22 }
 0x169   : > { %v1074_v59 = vpop.xlane.xlu1 %1073  ;;  %v1141_v56 = vrot.slane %v1084_v17, %v3100_v36  ;;  %v1153_v40 = vsel %vm1152_vm13, %v1125_v6, %v1151_v2 }
 0x16a   : > { %v1133_v55 = vrot.slane %v1074_v59, %v3100_v36 }
 0x16c   : > { %v1156_v46 = vsel %vm1142_vm3, %v1137_v20, %v1133_v55  ;;  %v1546_v53 = vpop.xlane.xlu0 %1545 }
 0x16d   : > { %v1069_v1 = vpop.xlane.xlu1 %1068  ;;  %v1157_v39 = vsel %vm1144_vm9, %v1141_v56, %v1156_v46  ;;  %v1593_v42 = vrot.slane %v1546_v53, %v3100_v36 }
 0x16e   : > { %v1129_v50 = vrot.slane %v1069_v1, %v3100_v36  ;;  %v1161_v12 = vadd.f32 %v1157_v39, %v1007_v16 }
 0x170   : > { %v1155_v14 = vsel %vm1154_vm14, %v1129_v50, %v1153_v40  ;;  %1165 = vst.msk [vmem:[%s2879_s12 + $0x8] sm:$0x7] %vm442_vm5, %v1161_v12 }
 0x171   : > { %v1160_v21 = vadd.f32 %v1155_v14, %v1006_v11  ;;  %v1543_v32 = vpop.xlane.xlu1 %1542 }
 0x172   : > { %v1589_v23 = vrot.slane %v1543_v32, %v3100_v36 }
 0x173   : > { %1163 = vst.msk [vmem:[%s2879_s12] sm:$0xff] %vm440_vm6, %v1160_v21  ;;  %v1552_v34 = vpop.xlane.xlu0 %1551 }
 0x174   : > { %v1626_v43 = vsel %vm1142_vm3, %v1589_v23, %v1585_v57  ;;  %v1601_v61 = vrot.slane %v1552_v34, %v3100_v36 }
 0x175   : > { %v1549_v48 = vpop.xlane.xlu1 %1548  ;;  %v1627_v29 = vsel %vm1144_vm9, %v1593_v42, %v1626_v43 }
 0x176   : > { %v1597_v60 = vrot.slane %v1549_v48, %v3100_v36 }
 0x178   : > { %v1628_v8 = vsel %vm1146_vm10, %v1597_v60, %v1627_v29 }
 0x179   : > { %v1555_v19 = vpop.xlane.xlu1 %1554  ;;  %v1629_v3 = vsel %vm1148_vm11, %v1601_v61, %v1628_v8 }
 0x17a   : > { %v1605_v41 = vrot.slane %v1555_v19, %v3100_v36 }
 0x17c   : > { %v1630_v31 = vsel %vm1150_vm12, %v1605_v41, %v1629_v3 }
 0x17d   : > { %v1564_v28 = vpop.xlane.xlu1 %1563 }
 0x17e   : > { %v1617_v63 = vrot.slane %v1564_v28, %v3100_v36 }
 0x181   : > { %v1558_v44 = vpop.xlane.xlu0 %1557 }
 0x182   : > { %v1609_v27 = vrot.slane %v1558_v44, %v3100_v36 }
 0x184   : > { %v1631_v18 = vsel %vm1152_vm13, %v1609_v27, %v1630_v31 }
 0x187   : > { %v1561_v30 = vpop.xlane.xlu1 %1560 }
 0x188   : > { %v1613_v5 = vrot.slane %v1561_v30, %v3100_v36 }
 0x18a   : > { %v1632_v45 = vsel %vm1154_vm14, %v1613_v5, %v1631_v18 }
 0x18b   : > { %v1637_v25 = vadd.f32 %v1632_v45, %v1469_v49 }
 0x18d   : > { %1640 = vst.msk [vmem:[%s2902_s15] sm:$0xff] %vm446_vm7, %v1637_v25  ;;  %v1567_v35 = vpop.xlane.xlu0 %1566 }
 0x18e   : > { %v1621_v52 = vrot.slane %v1567_v35, %v3100_v36 }
 0x190   : > { %v1633_v47 = vsel %vm1142_vm3, %v1621_v52, %v1617_v63 }
 0x193   : > { %v1570_v37 = vpop.xlane.xlu0 %1569 }
 0x194   : > { %v1625_v9 = vrot.slane %v1570_v37, %v3100_v36 }
 0x196   : > { %v1634_v0 = vsel %vm1144_vm9, %v1625_v9, %v1633_v47 }
 0x197   : > { %v1638_v10 = vadd.f32 %v1634_v0, %v1470_v58 }
 0x199   : > { %1642 = vst.msk [vmem:[%s2902_s15 + $0x8] sm:$0x7] %vm448_vm8, %v1638_v10 }
 0x19a PF: > { %s16_s22 = sadd.s32 1, %s2048_s22   ;;  %s3101_s18 = smov %s2036_s19 }
 0x19b   : > { %p13_p10 = scmp.ge.s32.totalorder %s16_s22, 4   ;;  %s3102_s19 = smov %s2121_s27 }
 0x19c   : > { %s3103_s20 = smov %s2044_s21  ;;  %s3104_s21 = smov %s3106_s23 }
 0x19d   :  { %15 = sbr.rel (!%p13_p10) target bundleno = 3 (0x3), region = 188 }

</bundles_post_ra>
